<compile_context>
chip_gen: v5e
topology: v5e:2x2
jax: 0.10.0
libtpu: 0.0.40
codegen_flags: <defaults>
</compile_context>

<pallas_src>
import functools
import math

import jax
import jax.numpy as jnp
from jax.experimental import pallas as pl
from jax.experimental.pallas import tpu as pltpu  # noqa: F401  (TPU backend)


# ----------------------------- fused kernel ---------------------------------

def _fused_transformer_kernel(*refs, num_blocks, num_heads, ln_eps=1e-5):
    """Whole transformer_v2 forward in a single kernel.

    refs = (x_ref, <8 param refs per block>..., final_w_ref, final_b_ref, o_ref)
    Per-block params (stored (in, out) so the kernel does x @ W):
      in_w (E,3E), in_b (1,3E), out_w (E,E), out_b (1,E),
      ln_g (1,E), ln_b (1,E), ffn_w (E,out), ffn_b (1,out)
    """
    x_ref = refs[0]
    o_ref = refs[-1]
    p = refs[1:-1]

    N, L, _ = x_ref.shape

    # Per-batch-element activation slabs kept as 2-D (L, E) values (lane = E).
    acts = [x_ref[n] for n in range(N)]

    idx = 0
    for _b in range(num_blocks):
        # Load each block's weights ONCE (hoisted out of the batch loop).
        in_w = p[idx][...]
        in_b = p[idx + 1][...]
        out_w = p[idx + 2][...]
        out_b = p[idx + 3][...]
        ln_g = p[idx + 4][...]
        ln_b = p[idx + 5][...]
        ffn_w = p[idx + 6][...]
        ffn_b = p[idx + 7][...]
        idx += 8

        E = in_w.shape[0]
        hd = E // num_heads
        scale = 1.0 / math.sqrt(hd)

        for n in range(N):
            h = acts[n]                                                 # (L, E)
            # fused QKV projection: one 2-D (L, E) x (E, 3E) matmul
            qkv = jnp.dot(h, in_w, preferred_element_type=jnp.float32) + in_b

            # attention + output projection accumulated per head
            att = out_b                                                 # (1, E) -> broadcasts
            for hh in range(num_heads):
                q = qkv[:, hh * hd:(hh + 1) * hd]                       # (L, hd)
                k = qkv[:, E + hh * hd:E + (hh + 1) * hd]
                v = qkv[:, 2 * E + hh * hd:2 * E + (hh + 1) * hd]
                s = jax.lax.dot_general(
                    q, k, (((1,), (1,)), ((), ())),
                    preferred_element_type=jnp.float32) * scale         # (L, L)
                s = s - jnp.max(s, axis=-1, keepdims=True)
                e = jnp.exp(s)
                pr = e * pl.reciprocal(jnp.sum(e, axis=-1, keepdims=True),
                                       approx=True)                     # softmax
                oh = jnp.dot(pr, v, preferred_element_type=jnp.float32)  # (L, hd)
                att = att + jnp.dot(oh, out_w[hh * hd:(hh + 1) * hd, :],
                                    preferred_element_type=jnp.float32)

            # residual add + LayerNorm (eps inside rsqrt, matching PyTorch)
            y = att + h
            mu = jnp.mean(y, axis=-1, keepdims=True)
            yc = y - mu
            var = jnp.mean(yc * yc, axis=-1, keepdims=True)
            y = yc * jax.lax.rsqrt(var + ln_eps) * ln_g + ln_b

            # block FFN: Linear + ReLU (dropout == identity in eval)
            acts[n] = jnp.maximum(
                jnp.dot(y, ffn_w, preferred_element_type=jnp.float32) + ffn_b,
                0.0)

    # final FFN over flattened (L * E_f) features, then ReLU and sigmoid
    fw = p[idx][...]          # (L*E_f, out)
    fb = p[idx + 1][...]      # (1, out)
    for n in range(N):
        h = acts[n]                                                     # (L, E_f)
        E_f = h.shape[-1]
        acc = fb
        for l in range(L):
            acc = acc + jnp.dot(h[l:l + 1, :], fw[l * E_f:(l + 1) * E_f, :],
                                preferred_element_type=jnp.float32)
        acc = jnp.maximum(acc, 0.0)
        acc = jax.nn.sigmoid(acc)
        o_ref[n:n + 1, :] = acc.astype(o_ref.dtype)


# ----------------------------- wrapper ---------------------------------------

def transformer_v2_forward(x, params, num_blocks, num_heads=2):
    """x: (batch, seq, feat) == PyTorch (N, L, E). Returns sigmoid(logits).flatten()."""
    N, L, _ = x.shape

    flat_params = []
    for blk in params['blocks']:
        flat_params += [blk['mha']['in_w'], blk['mha']['in_b'],
                        blk['mha']['out_w'], blk['mha']['out_b'],
                        blk['ln_g'], blk['ln_b'],
                        blk['ffn_w'], blk['ffn_b']]
    flat_params += [params['final_w'], params['final_b']]
    out_size = params['final_w'].shape[1]

    out = pl.pallas_call(
        functools.partial(_fused_transformer_kernel,
                          num_blocks=num_blocks, num_heads=num_heads),
        out_shape=jax.ShapeDtypeStruct((N, out_size), jnp.float32),
    )(x, *flat_params)                     # whole arrays resident in VMEM
    return out.reshape(-1)                 # F.sigmoid(x.flatten())


# ----------------------------- parameter init --------------------------------

def _kaiming_uniform(key, out_in):
    # matches FFN.init_layer: kaiming_uniform(mode='fan_in', nonlinearity='relu')
    fan_in = out_in[1]
    bound = math.sqrt(6.0 / fan_in)
    return jax.random.uniform(key, out_in, jnp.float32, -bound, bound)


def _xavier_uniform(key, out_in):
    fan_out, fan_in = out_in
    bound = math.sqrt(6.0 / (fan_in + fan_out))
    return jax.random.uniform(key, out_in, jnp.float32, -bound, bound)


def init_params(key, input_size, output_size, num_blocks, seq_len):
    params = {'blocks': []}
    out_sz = input_size
    for _ in range(num_blocks):
        in_sz = out_sz
        out_sz = int(out_sz / 4) * 2
        key, k1, k2, k3 = jax.random.split(key, 4)
        E = in_sz
        params['blocks'].append({
            'mha': {
                'in_w': _xavier_uniform(k1, (3 * E, E)).T,     # stored (in, out)
                'in_b': jnp.zeros((1, 3 * E), jnp.float32),
                'out_w': _xavier_uniform(k2, (E, E)).T,
                'out_b': jnp.zeros((1, E), jnp.float32),
            },
            'ln_g': jnp.ones((1, E), jnp.float32),
            'ln_b': jnp.zeros((1, E), jnp.float32),
            'ffn_w': _kaiming_uniform(k3, (out_sz, E)).T,
            'ffn_b': jnp.zeros((1, out_sz), jnp.float32),
        })
    key, kf = jax.random.split(key)
    params['final_w'] = _kaiming_uniform(kf, (output_size, out_sz * seq_len)).T
    params['final_b'] = jnp.zeros((1, output_size), jnp.float32)
    return params


# ---------------------------------- main --------------------------------------

if __name__ == "__main__":
    batch, seq_len = 2, 8
    input_size, output_size, num_blocks = 32, 4, 2   # E: 32 -> 16 -> 8 across blocks

    key = jax.random.PRNGKey(0)
    kx, kp = jax.random.split(key)
    x = jax.random.normal(kx, (batch, seq_len, input_size), jnp.float32)
    params = init_params(kp, input_size, output_size, num_blocks, seq_len)

    out = transformer_v2_forward(x, params, num_blocks)
    out = jax.block_until_ready(out)
    assert out.shape == (batch * output_size,)
    assert bool(jnp.all(jnp.isfinite(out)))
    assert bool(jnp.all((out >= 0.0) & (out <= 1.0)))
    print("KERNEL_OK")
</pallas_src>

<mosaic_0001>
module attributes {stable_mosaic.version = 11 : i64} {
  func.func @_fused_transformer_kernel(%arg0: memref<2x8x32xf32, #tpu.memory_space<vmem>>, %arg1: memref<32x96xf32, #tpu.memory_space<vmem>>, %arg2: memref<1x96xf32, #tpu.memory_space<vmem>>, %arg3: memref<32x32xf32, #tpu.memory_space<vmem>>, %arg4: memref<1x32xf32, #tpu.memory_space<vmem>>, %arg5: memref<1x32xf32, #tpu.memory_space<vmem>>, %arg6: memref<1x32xf32, #tpu.memory_space<vmem>>, %arg7: memref<32x16xf32, #tpu.memory_space<vmem>>, %arg8: memref<1x16xf32, #tpu.memory_space<vmem>>, %arg9: memref<16x48xf32, #tpu.memory_space<vmem>>, %arg10: memref<1x48xf32, #tpu.memory_space<vmem>>, %arg11: memref<16x16xf32, #tpu.memory_space<vmem>>, %arg12: memref<1x16xf32, #tpu.memory_space<vmem>>, %arg13: memref<1x16xf32, #tpu.memory_space<vmem>>, %arg14: memref<1x16xf32, #tpu.memory_space<vmem>>, %arg15: memref<16x8xf32, #tpu.memory_space<vmem>>, %arg16: memref<1x8xf32, #tpu.memory_space<vmem>>, %arg17: memref<64x4xf32, #tpu.memory_space<vmem>>, %arg18: memref<1x4xf32, #tpu.memory_space<vmem>>, %arg19: memref<2x4xf32, #tpu.memory_space<vmem>>) attributes {dimension_semantics = [], scalar_prefetch = 0 : i64, scratch_operands = 0 : i64, tpu.core_type = #tpu.core_type<tc>} {
    %c0 = arith.constant 0 : index
    %c0_0 = arith.constant 0 : index
    %c0_1 = arith.constant 0 : index
    %0 = vector.load %arg0[%c0, %c0_0, %c0_1] : memref<2x8x32xf32, #tpu.memory_space<vmem>>, vector<1x8x32xf32>
    %1 = vector.shape_cast %0 : vector<1x8x32xf32> to vector<8x32xf32>
    %c1 = arith.constant 1 : index
    %c0_2 = arith.constant 0 : index
    %c0_3 = arith.constant 0 : index
    %2 = vector.load %arg0[%c1, %c0_2, %c0_3] : memref<2x8x32xf32, #tpu.memory_space<vmem>>, vector<1x8x32xf32>
    %3 = vector.shape_cast %2 : vector<1x8x32xf32> to vector<8x32xf32>
    %c0_4 = arith.constant 0 : index
    %c0_5 = arith.constant 0 : index
    %4 = vector.load %arg1[%c0_4, %c0_5] : memref<32x96xf32, #tpu.memory_space<vmem>>, vector<32x96xf32>
    %c0_6 = arith.constant 0 : index
    %c0_7 = arith.constant 0 : index
    %5 = vector.load %arg2[%c0_6, %c0_7] : memref<1x96xf32, #tpu.memory_space<vmem>>, vector<1x96xf32>
    %c0_8 = arith.constant 0 : index
    %c0_9 = arith.constant 0 : index
    %6 = vector.load %arg3[%c0_8, %c0_9] : memref<32x32xf32, #tpu.memory_space<vmem>>, vector<32x32xf32>
    %c0_10 = arith.constant 0 : index
    %c0_11 = arith.constant 0 : index
    %7 = vector.load %arg4[%c0_10, %c0_11] : memref<1x32xf32, #tpu.memory_space<vmem>>, vector<1x32xf32>
    %c0_12 = arith.constant 0 : index
    %c0_13 = arith.constant 0 : index
    %8 = vector.load %arg5[%c0_12, %c0_13] : memref<1x32xf32, #tpu.memory_space<vmem>>, vector<1x32xf32>
    %c0_14 = arith.constant 0 : index
    %c0_15 = arith.constant 0 : index
    %9 = vector.load %arg6[%c0_14, %c0_15] : memref<1x32xf32, #tpu.memory_space<vmem>>, vector<1x32xf32>
    %c0_16 = arith.constant 0 : index
    %c0_17 = arith.constant 0 : index
    %10 = vector.load %arg7[%c0_16, %c0_17] : memref<32x16xf32, #tpu.memory_space<vmem>>, vector<32x16xf32>
    %c0_18 = arith.constant 0 : index
    %c0_19 = arith.constant 0 : index
    %11 = vector.load %arg8[%c0_18, %c0_19] : memref<1x16xf32, #tpu.memory_space<vmem>>, vector<1x16xf32>
    %cst = arith.constant dense<0.000000e+00> : vector<8x96xf32>
    %12 = tpu.matmul %1, %4, %cst {dimension_numbers = #tpu.dot_dimension_numbers<[1], [0], [0], [1], [0, 0, 1, 1], [], []>} : vector<8x32xf32>, vector<32x96xf32>, vector<8x96xf32> -> vector<8x96xf32>
    %13 = vector.broadcast %5 : vector<1x96xf32> to vector<8x96xf32>
    %14 = arith.addf %12, %13 : vector<8x96xf32>
    %15 = vector.extract_strided_slice %14 {offsets = [0, 0], sizes = [8, 16], strides = [1, 1]} : vector<8x96xf32> to vector<8x16xf32>
    %16 = vector.extract_strided_slice %14 {offsets = [0, 32], sizes = [8, 16], strides = [1, 1]} : vector<8x96xf32> to vector<8x16xf32>
    %17 = vector.extract_strided_slice %14 {offsets = [0, 64], sizes = [8, 16], strides = [1, 1]} : vector<8x96xf32> to vector<8x16xf32>
    %cst_20 = arith.constant dense<0.000000e+00> : vector<8x8xf32>
    %18 = tpu.matmul %15, %16, %cst_20 {dimension_numbers = #tpu.dot_dimension_numbers<[1], [1], [0], [0], [0, 0, 1, 0], [], []>} : vector<8x16xf32>, vector<8x16xf32>, vector<8x8xf32> -> vector<8x8xf32>
    %cst_21 = arith.constant 2.500000e-01 : f32
    %19 = vector.broadcast %cst_21 : f32 to vector<8x8xf32>
    %20 = arith.mulf %18, %19 : vector<8x8xf32>
    %cst_22 = arith.constant dense<0xFF800000> : vector<8xf32>
    %21 = vector.multi_reduction <maximumf>, %20, %cst_22 [1] : vector<8x8xf32> to vector<8xf32>
    %22 = vector.shape_cast %21 : vector<8xf32> to vector<8x1xf32>
    %23 = vector.broadcast %22 : vector<8x1xf32> to vector<8x8xf32>
    %24 = arith.subf %20, %23 : vector<8x8xf32>
    %25 = math.exp %24 : vector<8x8xf32>
    %cst_23 = arith.constant dense<0.000000e+00> : vector<8xf32>
    %26 = vector.multi_reduction <add>, %25, %cst_23 [1] : vector<8x8xf32> to vector<8xf32>
    %27 = vector.shape_cast %26 : vector<8xf32> to vector<8x1xf32>
    %28 = tpu.reciprocal %27 {approx = true} : vector<8x1xf32> -> vector<8x1xf32>
    %29 = vector.broadcast %28 : vector<8x1xf32> to vector<8x8xf32>
    %30 = arith.mulf %25, %29 : vector<8x8xf32>
    %cst_24 = arith.constant dense<0.000000e+00> : vector<8x16xf32>
    %31 = tpu.matmul %30, %17, %cst_24 {dimension_numbers = #tpu.dot_dimension_numbers<[1], [0], [0], [1], [0, 0, 1, 1], [], []>} : vector<8x8xf32>, vector<8x16xf32>, vector<8x16xf32> -> vector<8x16xf32>
    %32 = vector.extract_strided_slice %6 {offsets = [0, 0], sizes = [16, 32], strides = [1, 1]} : vector<32x32xf32> to vector<16x32xf32>
    %cst_25 = arith.constant dense<0.000000e+00> : vector<8x32xf32>
    %33 = tpu.matmul %31, %32, %cst_25 {dimension_numbers = #tpu.dot_dimension_numbers<[1], [0], [0], [1], [0, 0, 1, 1], [], []>} : vector<8x16xf32>, vector<16x32xf32>, vector<8x32xf32> -> vector<8x32xf32>
    %34 = vector.broadcast %7 : vector<1x32xf32> to vector<8x32xf32>
    %35 = arith.addf %34, %33 : vector<8x32xf32>
    %36 = vector.extract_strided_slice %14 {offsets = [0, 16], sizes = [8, 16], strides = [1, 1]} : vector<8x96xf32> to vector<8x16xf32>
    %37 = vector.extract_strided_slice %14 {offsets = [0, 48], sizes = [8, 16], strides = [1, 1]} : vector<8x96xf32> to vector<8x16xf32>
    %38 = vector.extract_strided_slice %14 {offsets = [0, 80], sizes = [8, 16], strides = [1, 1]} : vector<8x96xf32> to vector<8x16xf32>
    %cst_26 = arith.constant dense<0.000000e+00> : vector<8x8xf32>
    %39 = tpu.matmul %36, %37, %cst_26 {dimension_numbers = #tpu.dot_dimension_numbers<[1], [1], [0], [0], [0, 0, 1, 0], [], []>} : vector<8x16xf32>, vector<8x16xf32>, vector<8x8xf32> -> vector<8x8xf32>
    %cst_27 = arith.constant 2.500000e-01 : f32
    %40 = vector.broadcast %cst_27 : f32 to vector<8x8xf32>
    %41 = arith.mulf %39, %40 : vector<8x8xf32>
    %cst_28 = arith.constant dense<0xFF800000> : vector<8xf32>
    %42 = vector.multi_reduction <maximumf>, %41, %cst_28 [1] : vector<8x8xf32> to vector<8xf32>
    %43 = vector.shape_cast %42 : vector<8xf32> to vector<8x1xf32>
    %44 = vector.broadcast %43 : vector<8x1xf32> to vector<8x8xf32>
    %45 = arith.subf %41, %44 : vector<8x8xf32>
    %46 = math.exp %45 : vector<8x8xf32>
    %cst_29 = arith.constant dense<0.000000e+00> : vector<8xf32>
    %47 = vector.multi_reduction <add>, %46, %cst_29 [1] : vector<8x8xf32> to vector<8xf32>
    %48 = vector.shape_cast %47 : vector<8xf32> to vector<8x1xf32>
    %49 = tpu.reciprocal %48 {approx = true} : vector<8x1xf32> -> vector<8x1xf32>
    %50 = vector.broadcast %49 : vector<8x1xf32> to vector<8x8xf32>
    %51 = arith.mulf %46, %50 : vector<8x8xf32>
    %cst_30 = arith.constant dense<0.000000e+00> : vector<8x16xf32>
    %52 = tpu.matmul %51, %38, %cst_30 {dimension_numbers = #tpu.dot_dimension_numbers<[1], [0], [0], [1], [0, 0, 1, 1], [], []>} : vector<8x8xf32>, vector<8x16xf32>, vector<8x16xf32> -> vector<8x16xf32>
    %53 = vector.extract_strided_slice %6 {offsets = [16, 0], sizes = [16, 32], strides = [1, 1]} : vector<32x32xf32> to vector<16x32xf32>
    %cst_31 = arith.constant dense<0.000000e+00> : vector<8x32xf32>
    %54 = tpu.matmul %52, %53, %cst_31 {dimension_numbers = #tpu.dot_dimension_numbers<[1], [0], [0], [1], [0, 0, 1, 1], [], []>} : vector<8x16xf32>, vector<16x32xf32>, vector<8x32xf32> -> vector<8x32xf32>
    %55 = arith.addf %35, %54 : vector<8x32xf32>
    %56 = arith.addf %55, %1 : vector<8x32xf32>
    %cst_32 = arith.constant dense<0.000000e+00> : vector<8xf32>
    %57 = vector.multi_reduction <add>, %56, %cst_32 [1] : vector<8x32xf32> to vector<8xf32>
    %58 = vector.shape_cast %57 : vector<8xf32> to vector<8x1xf32>
    %cst_33 = arith.constant 3.200000e+01 : f32
    %59 = vector.broadcast %cst_33 : f32 to vector<8x1xf32>
    %60 = arith.divf %58, %59 : vector<8x1xf32>
    %61 = vector.broadcast %60 : vector<8x1xf32> to vector<8x32xf32>
    %62 = arith.subf %56, %61 : vector<8x32xf32>
    %63 = arith.mulf %62, %62 : vector<8x32xf32>
    %cst_34 = arith.constant dense<0.000000e+00> : vector<8xf32>
    %64 = vector.multi_reduction <add>, %63, %cst_34 [1] : vector<8x32xf32> to vector<8xf32>
    %65 = vector.shape_cast %64 : vector<8xf32> to vector<8x1xf32>
    %cst_35 = arith.constant 3.200000e+01 : f32
    %66 = vector.broadcast %cst_35 : f32 to vector<8x1xf32>
    %67 = arith.divf %65, %66 : vector<8x1xf32>
    %cst_36 = arith.constant 9.99999974E-6 : f32
    %68 = vector.broadcast %cst_36 : f32 to vector<8x1xf32>
    %69 = arith.addf %67, %68 : vector<8x1xf32>
    %70 = math.rsqrt %69 : vector<8x1xf32>
    %71 = vector.broadcast %70 : vector<8x1xf32> to vector<8x32xf32>
    %72 = arith.mulf %62, %71 : vector<8x32xf32>
    %73 = vector.broadcast %8 : vector<1x32xf32> to vector<8x32xf32>
    %74 = arith.mulf %72, %73 : vector<8x32xf32>
    %75 = vector.broadcast %9 : vector<1x32xf32> to vector<8x32xf32>
    %76 = arith.addf %74, %75 : vector<8x32xf32>
    %cst_37 = arith.constant dense<0.000000e+00> : vector<8x16xf32>
    %77 = tpu.matmul %76, %10, %cst_37 {dimension_numbers = #tpu.dot_dimension_numbers<[1], [0], [0], [1], [0, 0, 1, 1], [], []>} : vector<8x32xf32>, vector<32x16xf32>, vector<8x16xf32> -> vector<8x16xf32>
    %78 = vector.broadcast %11 : vector<1x16xf32> to vector<8x16xf32>
    %79 = arith.addf %77, %78 : vector<8x16xf32>
    %cst_38 = arith.constant 0.000000e+00 : f32
    %80 = vector.broadcast %cst_38 : f32 to vector<8x16xf32>
    %81 = arith.maximumf %79, %80 : vector<8x16xf32>
    %cst_39 = arith.constant dense<0.000000e+00> : vector<8x96xf32>
    %82 = tpu.matmul %3, %4, %cst_39 {dimension_numbers = #tpu.dot_dimension_numbers<[1], [0], [0], [1], [0, 0, 1, 1], [], []>} : vector<8x32xf32>, vector<32x96xf32>, vector<8x96xf32> -> vector<8x96xf32>
    %83 = vector.broadcast %5 : vector<1x96xf32> to vector<8x96xf32>
    %84 = arith.addf %82, %83 : vector<8x96xf32>
    %85 = vector.extract_strided_slice %84 {offsets = [0, 0], sizes = [8, 16], strides = [1, 1]} : vector<8x96xf32> to vector<8x16xf32>
    %86 = vector.extract_strided_slice %84 {offsets = [0, 32], sizes = [8, 16], strides = [1, 1]} : vector<8x96xf32> to vector<8x16xf32>
    %87 = vector.extract_strided_slice %84 {offsets = [0, 64], sizes = [8, 16], strides = [1, 1]} : vector<8x96xf32> to vector<8x16xf32>
    %cst_40 = arith.constant dense<0.000000e+00> : vector<8x8xf32>
    %88 = tpu.matmul %85, %86, %cst_40 {dimension_numbers = #tpu.dot_dimension_numbers<[1], [1], [0], [0], [0, 0, 1, 0], [], []>} : vector<8x16xf32>, vector<8x16xf32>, vector<8x8xf32> -> vector<8x8xf32>
    %cst_41 = arith.constant 2.500000e-01 : f32
    %89 = vector.broadcast %cst_41 : f32 to vector<8x8xf32>
    %90 = arith.mulf %88, %89 : vector<8x8xf32>
    %cst_42 = arith.constant dense<0xFF800000> : vector<8xf32>
    %91 = vector.multi_reduction <maximumf>, %90, %cst_42 [1] : vector<8x8xf32> to vector<8xf32>
    %92 = vector.shape_cast %91 : vector<8xf32> to vector<8x1xf32>
    %93 = vector.broadcast %92 : vector<8x1xf32> to vector<8x8xf32>
    %94 = arith.subf %90, %93 : vector<8x8xf32>
    %95 = math.exp %94 : vector<8x8xf32>
    %cst_43 = arith.constant dense<0.000000e+00> : vector<8xf32>
    %96 = vector.multi_reduction <add>, %95, %cst_43 [1] : vector<8x8xf32> to vector<8xf32>
    %97 = vector.shape_cast %96 : vector<8xf32> to vector<8x1xf32>
    %98 = tpu.reciprocal %97 {approx = true} : vector<8x1xf32> -> vector<8x1xf32>
    %99 = vector.broadcast %98 : vector<8x1xf32> to vector<8x8xf32>
    %100 = arith.mulf %95, %99 : vector<8x8xf32>
    %cst_44 = arith.constant dense<0.000000e+00> : vector<8x16xf32>
    %101 = tpu.matmul %100, %87, %cst_44 {dimension_numbers = #tpu.dot_dimension_numbers<[1], [0], [0], [1], [0, 0, 1, 1], [], []>} : vector<8x8xf32>, vector<8x16xf32>, vector<8x16xf32> -> vector<8x16xf32>
    %102 = vector.extract_strided_slice %6 {offsets = [0, 0], sizes = [16, 32], strides = [1, 1]} : vector<32x32xf32> to vector<16x32xf32>
    %cst_45 = arith.constant dense<0.000000e+00> : vector<8x32xf32>
    %103 = tpu.matmul %101, %102, %cst_45 {dimension_numbers = #tpu.dot_dimension_numbers<[1], [0], [0], [1], [0, 0, 1, 1], [], []>} : vector<8x16xf32>, vector<16x32xf32>, vector<8x32xf32> -> vector<8x32xf32>
    %104 = vector.broadcast %7 : vector<1x32xf32> to vector<8x32xf32>
    %105 = arith.addf %104, %103 : vector<8x32xf32>
    %106 = vector.extract_strided_slice %84 {offsets = [0, 16], sizes = [8, 16], strides = [1, 1]} : vector<8x96xf32> to vector<8x16xf32>
    %107 = vector.extract_strided_slice %84 {offsets = [0, 48], sizes = [8, 16], strides = [1, 1]} : vector<8x96xf32> to vector<8x16xf32>
    %108 = vector.extract_strided_slice %84 {offsets = [0, 80], sizes = [8, 16], strides = [1, 1]} : vector<8x96xf32> to vector<8x16xf32>
    %cst_46 = arith.constant dense<0.000000e+00> : vector<8x8xf32>
    %109 = tpu.matmul %106, %107, %cst_46 {dimension_numbers = #tpu.dot_dimension_numbers<[1], [1], [0], [0], [0, 0, 1, 0], [], []>} : vector<8x16xf32>, vector<8x16xf32>, vector<8x8xf32> -> vector<8x8xf32>
    %cst_47 = arith.constant 2.500000e-01 : f32
    %110 = vector.broadcast %cst_47 : f32 to vector<8x8xf32>
    %111 = arith.mulf %109, %110 : vector<8x8xf32>
    %cst_48 = arith.constant dense<0xFF800000> : vector<8xf32>
    %112 = vector.multi_reduction <maximumf>, %111, %cst_48 [1] : vector<8x8xf32> to vector<8xf32>
    %113 = vector.shape_cast %112 : vector<8xf32> to vector<8x1xf32>
    %114 = vector.broadcast %113 : vector<8x1xf32> to vector<8x8xf32>
    %115 = arith.subf %111, %114 : vector<8x8xf32>
    %116 = math.exp %115 : vector<8x8xf32>
    %cst_49 = arith.constant dense<0.000000e+00> : vector<8xf32>
    %117 = vector.multi_reduction <add>, %116, %cst_49 [1] : vector<8x8xf32> to vector<8xf32>
    %118 = vector.shape_cast %117 : vector<8xf32> to vector<8x1xf32>
    %119 = tpu.reciprocal %118 {approx = true} : vector<8x1xf32> -> vector<8x1xf32>
    %120 = vector.broadcast %119 : vector<8x1xf32> to vector<8x8xf32>
    %121 = arith.mulf %116, %120 : vector<8x8xf32>
    %cst_50 = arith.constant dense<0.000000e+00> : vector<8x16xf32>
    %122 = tpu.matmul %121, %108, %cst_50 {dimension_numbers = #tpu.dot_dimension_numbers<[1], [0], [0], [1], [0, 0, 1, 1], [], []>} : vector<8x8xf32>, vector<8x16xf32>, vector<8x16xf32> -> vector<8x16xf32>
    %123 = vector.extract_strided_slice %6 {offsets = [16, 0], sizes = [16, 32], strides = [1, 1]} : vector<32x32xf32> to vector<16x32xf32>
    %cst_51 = arith.constant dense<0.000000e+00> : vector<8x32xf32>
    %124 = tpu.matmul %122, %123, %cst_51 {dimension_numbers = #tpu.dot_dimension_numbers<[1], [0], [0], [1], [0, 0, 1, 1], [], []>} : vector<8x16xf32>, vector<16x32xf32>, vector<8x32xf32> -> vector<8x32xf32>
    %125 = arith.addf %105, %124 : vector<8x32xf32>
    %126 = arith.addf %125, %3 : vector<8x32xf32>
    %cst_52 = arith.constant dense<0.000000e+00> : vector<8xf32>
    %127 = vector.multi_reduction <add>, %126, %cst_52 [1] : vector<8x32xf32> to vector<8xf32>
    %128 = vector.shape_cast %127 : vector<8xf32> to vector<8x1xf32>
    %cst_53 = arith.constant 3.200000e+01 : f32
    %129 = vector.broadcast %cst_53 : f32 to vector<8x1xf32>
    %130 = arith.divf %128, %129 : vector<8x1xf32>
    %131 = vector.broadcast %130 : vector<8x1xf32> to vector<8x32xf32>
    %132 = arith.subf %126, %131 : vector<8x32xf32>
    %133 = arith.mulf %132, %132 : vector<8x32xf32>
    %cst_54 = arith.constant dense<0.000000e+00> : vector<8xf32>
    %134 = vector.multi_reduction <add>, %133, %cst_54 [1] : vector<8x32xf32> to vector<8xf32>
    %135 = vector.shape_cast %134 : vector<8xf32> to vector<8x1xf32>
    %cst_55 = arith.constant 3.200000e+01 : f32
    %136 = vector.broadcast %cst_55 : f32 to vector<8x1xf32>
    %137 = arith.divf %135, %136 : vector<8x1xf32>
    %cst_56 = arith.constant 9.99999974E-6 : f32
    %138 = vector.broadcast %cst_56 : f32 to vector<8x1xf32>
    %139 = arith.addf %137, %138 : vector<8x1xf32>
    %140 = math.rsqrt %139 : vector<8x1xf32>
    %141 = vector.broadcast %140 : vector<8x1xf32> to vector<8x32xf32>
    %142 = arith.mulf %132, %141 : vector<8x32xf32>
    %143 = vector.broadcast %8 : vector<1x32xf32> to vector<8x32xf32>
    %144 = arith.mulf %142, %143 : vector<8x32xf32>
    %145 = vector.broadcast %9 : vector<1x32xf32> to vector<8x32xf32>
    %146 = arith.addf %144, %145 : vector<8x32xf32>
    %cst_57 = arith.constant dense<0.000000e+00> : vector<8x16xf32>
    %147 = tpu.matmul %146, %10, %cst_57 {dimension_numbers = #tpu.dot_dimension_numbers<[1], [0], [0], [1], [0, 0, 1, 1], [], []>} : vector<8x32xf32>, vector<32x16xf32>, vector<8x16xf32> -> vector<8x16xf32>
    %148 = vector.broadcast %11 : vector<1x16xf32> to vector<8x16xf32>
    %149 = arith.addf %147, %148 : vector<8x16xf32>
    %cst_58 = arith.constant 0.000000e+00 : f32
    %150 = vector.broadcast %cst_58 : f32 to vector<8x16xf32>
    %151 = arith.maximumf %149, %150 : vector<8x16xf32>
    %c0_59 = arith.constant 0 : index
    %c0_60 = arith.constant 0 : index
    %152 = vector.load %arg9[%c0_59, %c0_60] : memref<16x48xf32, #tpu.memory_space<vmem>>, vector<16x48xf32>
    %c0_61 = arith.constant 0 : index
    %c0_62 = arith.constant 0 : index
    %153 = vector.load %arg10[%c0_61, %c0_62] : memref<1x48xf32, #tpu.memory_space<vmem>>, vector<1x48xf32>
    %c0_63 = arith.constant 0 : index
    %c0_64 = arith.constant 0 : index
    %154 = vector.load %arg11[%c0_63, %c0_64] : memref<16x16xf32, #tpu.memory_space<vmem>>, vector<16x16xf32>
    %c0_65 = arith.constant 0 : index
    %c0_66 = arith.constant 0 : index
    %155 = vector.load %arg12[%c0_65, %c0_66] : memref<1x16xf32, #tpu.memory_space<vmem>>, vector<1x16xf32>
    %c0_67 = arith.constant 0 : index
    %c0_68 = arith.constant 0 : index
    %156 = vector.load %arg13[%c0_67, %c0_68] : memref<1x16xf32, #tpu.memory_space<vmem>>, vector<1x16xf32>
    %c0_69 = arith.constant 0 : index
    %c0_70 = arith.constant 0 : index
    %157 = vector.load %arg14[%c0_69, %c0_70] : memref<1x16xf32, #tpu.memory_space<vmem>>, vector<1x16xf32>
    %c0_71 = arith.constant 0 : index
    %c0_72 = arith.constant 0 : index
    %158 = vector.load %arg15[%c0_71, %c0_72] : memref<16x8xf32, #tpu.memory_space<vmem>>, vector<16x8xf32>
    %c0_73 = arith.constant 0 : index
    %c0_74 = arith.constant 0 : index
    %159 = vector.load %arg16[%c0_73, %c0_74] : memref<1x8xf32, #tpu.memory_space<vmem>>, vector<1x8xf32>
    %cst_75 = arith.constant dense<0.000000e+00> : vector<8x48xf32>
    %160 = tpu.matmul %81, %152, %cst_75 {dimension_numbers = #tpu.dot_dimension_numbers<[1], [0], [0], [1], [0, 0, 1, 1], [], []>} : vector<8x16xf32>, vector<16x48xf32>, vector<8x48xf32> -> vector<8x48xf32>
    %161 = vector.broadcast %153 : vector<1x48xf32> to vector<8x48xf32>
    %162 = arith.addf %160, %161 : vector<8x48xf32>
    %163 = vector.extract_strided_slice %162 {offsets = [0, 0], sizes = [8, 8], strides = [1, 1]} : vector<8x48xf32> to vector<8x8xf32>
    %164 = vector.extract_strided_slice %162 {offsets = [0, 16], sizes = [8, 8], strides = [1, 1]} : vector<8x48xf32> to vector<8x8xf32>
    %165 = vector.extract_strided_slice %162 {offsets = [0, 32], sizes = [8, 8], strides = [1, 1]} : vector<8x48xf32> to vector<8x8xf32>
    %cst_76 = arith.constant dense<0.000000e+00> : vector<8x8xf32>
    %166 = tpu.matmul %163, %164, %cst_76 {dimension_numbers = #tpu.dot_dimension_numbers<[1], [1], [0], [0], [0, 0, 1, 0], [], []>} : vector<8x8xf32>, vector<8x8xf32>, vector<8x8xf32> -> vector<8x8xf32>
    %cst_77 = arith.constant 0.353553385 : f32
    %167 = vector.broadcast %cst_77 : f32 to vector<8x8xf32>
    %168 = arith.mulf %166, %167 : vector<8x8xf32>
    %cst_78 = arith.constant dense<0xFF800000> : vector<8xf32>
    %169 = vector.multi_reduction <maximumf>, %168, %cst_78 [1] : vector<8x8xf32> to vector<8xf32>
    %170 = vector.shape_cast %169 : vector<8xf32> to vector<8x1xf32>
    %171 = vector.broadcast %170 : vector<8x1xf32> to vector<8x8xf32>
    %172 = arith.subf %168, %171 : vector<8x8xf32>
    %173 = math.exp %172 : vector<8x8xf32>
    %cst_79 = arith.constant dense<0.000000e+00> : vector<8xf32>
    %174 = vector.multi_reduction <add>, %173, %cst_79 [1] : vector<8x8xf32> to vector<8xf32>
    %175 = vector.shape_cast %174 : vector<8xf32> to vector<8x1xf32>
    %176 = tpu.reciprocal %175 {approx = true} : vector<8x1xf32> -> vector<8x1xf32>
    %177 = vector.broadcast %176 : vector<8x1xf32> to vector<8x8xf32>
    %178 = arith.mulf %173, %177 : vector<8x8xf32>
    %cst_80 = arith.constant dense<0.000000e+00> : vector<8x8xf32>
    %179 = tpu.matmul %178, %165, %cst_80 {dimension_numbers = #tpu.dot_dimension_numbers<[1], [0], [0], [1], [0, 0, 1, 1], [], []>} : vector<8x8xf32>, vector<8x8xf32>, vector<8x8xf32> -> vector<8x8xf32>
    %180 = vector.extract_strided_slice %154 {offsets = [0, 0], sizes = [8, 16], strides = [1, 1]} : vector<16x16xf32> to vector<8x16xf32>
    %cst_81 = arith.constant dense<0.000000e+00> : vector<8x16xf32>
    %181 = tpu.matmul %179, %180, %cst_81 {dimension_numbers = #tpu.dot_dimension_numbers<[1], [0], [0], [1], [0, 0, 1, 1], [], []>} : vector<8x8xf32>, vector<8x16xf32>, vector<8x16xf32> -> vector<8x16xf32>
    %182 = vector.broadcast %155 : vector<1x16xf32> to vector<8x16xf32>
    %183 = arith.addf %182, %181 : vector<8x16xf32>
    %184 = vector.extract_strided_slice %162 {offsets = [0, 8], sizes = [8, 8], strides = [1, 1]} : vector<8x48xf32> to vector<8x8xf32>
    %185 = vector.extract_strided_slice %162 {offsets = [0, 24], sizes = [8, 8], strides = [1, 1]} : vector<8x48xf32> to vector<8x8xf32>
    %186 = vector.extract_strided_slice %162 {offsets = [0, 40], sizes = [8, 8], strides = [1, 1]} : vector<8x48xf32> to vector<8x8xf32>
    %cst_82 = arith.constant dense<0.000000e+00> : vector<8x8xf32>
    %187 = tpu.matmul %184, %185, %cst_82 {dimension_numbers = #tpu.dot_dimension_numbers<[1], [1], [0], [0], [0, 0, 1, 0], [], []>} : vector<8x8xf32>, vector<8x8xf32>, vector<8x8xf32> -> vector<8x8xf32>
    %cst_83 = arith.constant 0.353553385 : f32
    %188 = vector.broadcast %cst_83 : f32 to vector<8x8xf32>
    %189 = arith.mulf %187, %188 : vector<8x8xf32>
    %cst_84 = arith.constant dense<0xFF800000> : vector<8xf32>
    %190 = vector.multi_reduction <maximumf>, %189, %cst_84 [1] : vector<8x8xf32> to vector<8xf32>
    %191 = vector.shape_cast %190 : vector<8xf32> to vector<8x1xf32>
    %192 = vector.broadcast %191 : vector<8x1xf32> to vector<8x8xf32>
    %193 = arith.subf %189, %192 : vector<8x8xf32>
    %194 = math.exp %193 : vector<8x8xf32>
    %cst_85 = arith.constant dense<0.000000e+00> : vector<8xf32>
    %195 = vector.multi_reduction <add>, %194, %cst_85 [1] : vector<8x8xf32> to vector<8xf32>
    %196 = vector.shape_cast %195 : vector<8xf32> to vector<8x1xf32>
    %197 = tpu.reciprocal %196 {approx = true} : vector<8x1xf32> -> vector<8x1xf32>
    %198 = vector.broadcast %197 : vector<8x1xf32> to vector<8x8xf32>
    %199 = arith.mulf %194, %198 : vector<8x8xf32>
    %cst_86 = arith.constant dense<0.000000e+00> : vector<8x8xf32>
    %200 = tpu.matmul %199, %186, %cst_86 {dimension_numbers = #tpu.dot_dimension_numbers<[1], [0], [0], [1], [0, 0, 1, 1], [], []>} : vector<8x8xf32>, vector<8x8xf32>, vector<8x8xf32> -> vector<8x8xf32>
    %201 = vector.extract_strided_slice %154 {offsets = [8, 0], sizes = [8, 16], strides = [1, 1]} : vector<16x16xf32> to vector<8x16xf32>
    %cst_87 = arith.constant dense<0.000000e+00> : vector<8x16xf32>
    %202 = tpu.matmul %200, %201, %cst_87 {dimension_numbers = #tpu.dot_dimension_numbers<[1], [0], [0], [1], [0, 0, 1, 1], [], []>} : vector<8x8xf32>, vector<8x16xf32>, vector<8x16xf32> -> vector<8x16xf32>
    %203 = arith.addf %183, %202 : vector<8x16xf32>
    %204 = arith.addf %203, %81 : vector<8x16xf32>
    %cst_88 = arith.constant dense<0.000000e+00> : vector<8xf32>
    %205 = vector.multi_reduction <add>, %204, %cst_88 [1] : vector<8x16xf32> to vector<8xf32>
    %206 = vector.shape_cast %205 : vector<8xf32> to vector<8x1xf32>
    %cst_89 = arith.constant 1.600000e+01 : f32
    %207 = vector.broadcast %cst_89 : f32 to vector<8x1xf32>
    %208 = arith.divf %206, %207 : vector<8x1xf32>
    %209 = vector.broadcast %208 : vector<8x1xf32> to vector<8x16xf32>
    %210 = arith.subf %204, %209 : vector<8x16xf32>
    %211 = arith.mulf %210, %210 : vector<8x16xf32>
    %cst_90 = arith.constant dense<0.000000e+00> : vector<8xf32>
    %212 = vector.multi_reduction <add>, %211, %cst_90 [1] : vector<8x16xf32> to vector<8xf32>
    %213 = vector.shape_cast %212 : vector<8xf32> to vector<8x1xf32>
    %cst_91 = arith.constant 1.600000e+01 : f32
    %214 = vector.broadcast %cst_91 : f32 to vector<8x1xf32>
    %215 = arith.divf %213, %214 : vector<8x1xf32>
    %cst_92 = arith.constant 9.99999974E-6 : f32
    %216 = vector.broadcast %cst_92 : f32 to vector<8x1xf32>
    %217 = arith.addf %215, %216 : vector<8x1xf32>
    %218 = math.rsqrt %217 : vector<8x1xf32>
    %219 = vector.broadcast %218 : vector<8x1xf32> to vector<8x16xf32>
    %220 = arith.mulf %210, %219 : vector<8x16xf32>
    %221 = vector.broadcast %156 : vector<1x16xf32> to vector<8x16xf32>
    %222 = arith.mulf %220, %221 : vector<8x16xf32>
    %223 = vector.broadcast %157 : vector<1x16xf32> to vector<8x16xf32>
    %224 = arith.addf %222, %223 : vector<8x16xf32>
    %cst_93 = arith.constant dense<0.000000e+00> : vector<8x8xf32>
    %225 = tpu.matmul %224, %158, %cst_93 {dimension_numbers = #tpu.dot_dimension_numbers<[1], [0], [0], [1], [0, 0, 1, 1], [], []>} : vector<8x16xf32>, vector<16x8xf32>, vector<8x8xf32> -> vector<8x8xf32>
    %226 = vector.broadcast %159 : vector<1x8xf32> to vector<8x8xf32>
    %227 = arith.addf %225, %226 : vector<8x8xf32>
    %cst_94 = arith.constant 0.000000e+00 : f32
    %228 = vector.broadcast %cst_94 : f32 to vector<8x8xf32>
    %229 = arith.maximumf %227, %228 : vector<8x8xf32>
    %cst_95 = arith.constant dense<0.000000e+00> : vector<8x48xf32>
    %230 = tpu.matmul %151, %152, %cst_95 {dimension_numbers = #tpu.dot_dimension_numbers<[1], [0], [0], [1], [0, 0, 1, 1], [], []>} : vector<8x16xf32>, vector<16x48xf32>, vector<8x48xf32> -> vector<8x48xf32>
    %231 = vector.broadcast %153 : vector<1x48xf32> to vector<8x48xf32>
    %232 = arith.addf %230, %231 : vector<8x48xf32>
    %233 = vector.extract_strided_slice %232 {offsets = [0, 0], sizes = [8, 8], strides = [1, 1]} : vector<8x48xf32> to vector<8x8xf32>
    %234 = vector.extract_strided_slice %232 {offsets = [0, 16], sizes = [8, 8], strides = [1, 1]} : vector<8x48xf32> to vector<8x8xf32>
    %235 = vector.extract_strided_slice %232 {offsets = [0, 32], sizes = [8, 8], strides = [1, 1]} : vector<8x48xf32> to vector<8x8xf32>
    %cst_96 = arith.constant dense<0.000000e+00> : vector<8x8xf32>
    %236 = tpu.matmul %233, %234, %cst_96 {dimension_numbers = #tpu.dot_dimension_numbers<[1], [1], [0], [0], [0, 0, 1, 0], [], []>} : vector<8x8xf32>, vector<8x8xf32>, vector<8x8xf32> -> vector<8x8xf32>
    %cst_97 = arith.constant 0.353553385 : f32
    %237 = vector.broadcast %cst_97 : f32 to vector<8x8xf32>
    %238 = arith.mulf %236, %237 : vector<8x8xf32>
    %cst_98 = arith.constant dense<0xFF800000> : vector<8xf32>
    %239 = vector.multi_reduction <maximumf>, %238, %cst_98 [1] : vector<8x8xf32> to vector<8xf32>
    %240 = vector.shape_cast %239 : vector<8xf32> to vector<8x1xf32>
    %241 = vector.broadcast %240 : vector<8x1xf32> to vector<8x8xf32>
    %242 = arith.subf %238, %241 : vector<8x8xf32>
    %243 = math.exp %242 : vector<8x8xf32>
    %cst_99 = arith.constant dense<0.000000e+00> : vector<8xf32>
    %244 = vector.multi_reduction <add>, %243, %cst_99 [1] : vector<8x8xf32> to vector<8xf32>
    %245 = vector.shape_cast %244 : vector<8xf32> to vector<8x1xf32>
    %246 = tpu.reciprocal %245 {approx = true} : vector<8x1xf32> -> vector<8x1xf32>
    %247 = vector.broadcast %246 : vector<8x1xf32> to vector<8x8xf32>
    %248 = arith.mulf %243, %247 : vector<8x8xf32>
    %cst_100 = arith.constant dense<0.000000e+00> : vector<8x8xf32>
    %249 = tpu.matmul %248, %235, %cst_100 {dimension_numbers = #tpu.dot_dimension_numbers<[1], [0], [0], [1], [0, 0, 1, 1], [], []>} : vector<8x8xf32>, vector<8x8xf32>, vector<8x8xf32> -> vector<8x8xf32>
    %250 = vector.extract_strided_slice %154 {offsets = [0, 0], sizes = [8, 16], strides = [1, 1]} : vector<16x16xf32> to vector<8x16xf32>
    %cst_101 = arith.constant dense<0.000000e+00> : vector<8x16xf32>
    %251 = tpu.matmul %249, %250, %cst_101 {dimension_numbers = #tpu.dot_dimension_numbers<[1], [0], [0], [1], [0, 0, 1, 1], [], []>} : vector<8x8xf32>, vector<8x16xf32>, vector<8x16xf32> -> vector<8x16xf32>
    %252 = vector.broadcast %155 : vector<1x16xf32> to vector<8x16xf32>
    %253 = arith.addf %252, %251 : vector<8x16xf32>
    %254 = vector.extract_strided_slice %232 {offsets = [0, 8], sizes = [8, 8], strides = [1, 1]} : vector<8x48xf32> to vector<8x8xf32>
    %255 = vector.extract_strided_slice %232 {offsets = [0, 24], sizes = [8, 8], strides = [1, 1]} : vector<8x48xf32> to vector<8x8xf32>
    %256 = vector.extract_strided_slice %232 {offsets = [0, 40], sizes = [8, 8], strides = [1, 1]} : vector<8x48xf32> to vector<8x8xf32>
    %cst_102 = arith.constant dense<0.000000e+00> : vector<8x8xf32>
    %257 = tpu.matmul %254, %255, %cst_102 {dimension_numbers = #tpu.dot_dimension_numbers<[1], [1], [0], [0], [0, 0, 1, 0], [], []>} : vector<8x8xf32>, vector<8x8xf32>, vector<8x8xf32> -> vector<8x8xf32>
    %cst_103 = arith.constant 0.353553385 : f32
    %258 = vector.broadcast %cst_103 : f32 to vector<8x8xf32>
    %259 = arith.mulf %257, %258 : vector<8x8xf32>
    %cst_104 = arith.constant dense<0xFF800000> : vector<8xf32>
    %260 = vector.multi_reduction <maximumf>, %259, %cst_104 [1] : vector<8x8xf32> to vector<8xf32>
    %261 = vector.shape_cast %260 : vector<8xf32> to vector<8x1xf32>
    %262 = vector.broadcast %261 : vector<8x1xf32> to vector<8x8xf32>
    %263 = arith.subf %259, %262 : vector<8x8xf32>
    %264 = math.exp %263 : vector<8x8xf32>
    %cst_105 = arith.constant dense<0.000000e+00> : vector<8xf32>
    %265 = vector.multi_reduction <add>, %264, %cst_105 [1] : vector<8x8xf32> to vector<8xf32>
    %266 = vector.shape_cast %265 : vector<8xf32> to vector<8x1xf32>
    %267 = tpu.reciprocal %266 {approx = true} : vector<8x1xf32> -> vector<8x1xf32>
    %268 = vector.broadcast %267 : vector<8x1xf32> to vector<8x8xf32>
    %269 = arith.mulf %264, %268 : vector<8x8xf32>
    %cst_106 = arith.constant dense<0.000000e+00> : vector<8x8xf32>
    %270 = tpu.matmul %269, %256, %cst_106 {dimension_numbers = #tpu.dot_dimension_numbers<[1], [0], [0], [1], [0, 0, 1, 1], [], []>} : vector<8x8xf32>, vector<8x8xf32>, vector<8x8xf32> -> vector<8x8xf32>
    %271 = vector.extract_strided_slice %154 {offsets = [8, 0], sizes = [8, 16], strides = [1, 1]} : vector<16x16xf32> to vector<8x16xf32>
    %cst_107 = arith.constant dense<0.000000e+00> : vector<8x16xf32>
    %272 = tpu.matmul %270, %271, %cst_107 {dimension_numbers = #tpu.dot_dimension_numbers<[1], [0], [0], [1], [0, 0, 1, 1], [], []>} : vector<8x8xf32>, vector<8x16xf32>, vector<8x16xf32> -> vector<8x16xf32>
    %273 = arith.addf %253, %272 : vector<8x16xf32>
    %274 = arith.addf %273, %151 : vector<8x16xf32>
    %cst_108 = arith.constant dense<0.000000e+00> : vector<8xf32>
    %275 = vector.multi_reduction <add>, %274, %cst_108 [1] : vector<8x16xf32> to vector<8xf32>
    %276 = vector.shape_cast %275 : vector<8xf32> to vector<8x1xf32>
    %cst_109 = arith.constant 1.600000e+01 : f32
    %277 = vector.broadcast %cst_109 : f32 to vector<8x1xf32>
    %278 = arith.divf %276, %277 : vector<8x1xf32>
    %279 = vector.broadcast %278 : vector<8x1xf32> to vector<8x16xf32>
    %280 = arith.subf %274, %279 : vector<8x16xf32>
    %281 = arith.mulf %280, %280 : vector<8x16xf32>
    %cst_110 = arith.constant dense<0.000000e+00> : vector<8xf32>
    %282 = vector.multi_reduction <add>, %281, %cst_110 [1] : vector<8x16xf32> to vector<8xf32>
    %283 = vector.shape_cast %282 : vector<8xf32> to vector<8x1xf32>
    %cst_111 = arith.constant 1.600000e+01 : f32
    %284 = vector.broadcast %cst_111 : f32 to vector<8x1xf32>
    %285 = arith.divf %283, %284 : vector<8x1xf32>
    %cst_112 = arith.constant 9.99999974E-6 : f32
    %286 = vector.broadcast %cst_112 : f32 to vector<8x1xf32>
    %287 = arith.addf %285, %286 : vector<8x1xf32>
    %288 = math.rsqrt %287 : vector<8x1xf32>
    %289 = vector.broadcast %288 : vector<8x1xf32> to vector<8x16xf32>
    %290 = arith.mulf %280, %289 : vector<8x16xf32>
    %291 = vector.broadcast %156 : vector<1x16xf32> to vector<8x16xf32>
    %292 = arith.mulf %290, %291 : vector<8x16xf32>
    %293 = vector.broadcast %157 : vector<1x16xf32> to vector<8x16xf32>
    %294 = arith.addf %292, %293 : vector<8x16xf32>
    %cst_113 = arith.constant dense<0.000000e+00> : vector<8x8xf32>
    %295 = tpu.matmul %294, %158, %cst_113 {dimension_numbers = #tpu.dot_dimension_numbers<[1], [0], [0], [1], [0, 0, 1, 1], [], []>} : vector<8x16xf32>, vector<16x8xf32>, vector<8x8xf32> -> vector<8x8xf32>
    %296 = vector.broadcast %159 : vector<1x8xf32> to vector<8x8xf32>
    %297 = arith.addf %295, %296 : vector<8x8xf32>
    %cst_114 = arith.constant 0.000000e+00 : f32
    %298 = vector.broadcast %cst_114 : f32 to vector<8x8xf32>
    %299 = arith.maximumf %297, %298 : vector<8x8xf32>
    %c0_115 = arith.constant 0 : index
    %c0_116 = arith.constant 0 : index
    %300 = vector.load %arg17[%c0_115, %c0_116] : memref<64x4xf32, #tpu.memory_space<vmem>>, vector<64x4xf32>
    %c0_117 = arith.constant 0 : index
    %c0_118 = arith.constant 0 : index
    %301 = vector.load %arg18[%c0_117, %c0_118] : memref<1x4xf32, #tpu.memory_space<vmem>>, vector<1x4xf32>
    %302 = vector.extract_strided_slice %229 {offsets = [0, 0], sizes = [1, 8], strides = [1, 1]} : vector<8x8xf32> to vector<1x8xf32>
    %303 = vector.extract_strided_slice %300 {offsets = [0, 0], sizes = [8, 4], strides = [1, 1]} : vector<64x4xf32> to vector<8x4xf32>
    %cst_119 = arith.constant dense<0.000000e+00> : vector<1x4xf32>
    %304 = tpu.matmul %302, %303, %cst_119 {dimension_numbers = #tpu.dot_dimension_numbers<[1], [0], [0], [1], [0, 0, 1, 1], [], []>} : vector<1x8xf32>, vector<8x4xf32>, vector<1x4xf32> -> vector<1x4xf32>
    %305 = arith.addf %301, %304 : vector<1x4xf32>
    %306 = vector.extract_strided_slice %229 {offsets = [1, 0], sizes = [1, 8], strides = [1, 1]} : vector<8x8xf32> to vector<1x8xf32>
    %307 = vector.extract_strided_slice %300 {offsets = [8, 0], sizes = [8, 4], strides = [1, 1]} : vector<64x4xf32> to vector<8x4xf32>
    %cst_120 = arith.constant dense<0.000000e+00> : vector<1x4xf32>
    %308 = tpu.matmul %306, %307, %cst_120 {dimension_numbers = #tpu.dot_dimension_numbers<[1], [0], [0], [1], [0, 0, 1, 1], [], []>} : vector<1x8xf32>, vector<8x4xf32>, vector<1x4xf32> -> vector<1x4xf32>
    %309 = arith.addf %305, %308 : vector<1x4xf32>
    %310 = vector.extract_strided_slice %229 {offsets = [2, 0], sizes = [1, 8], strides = [1, 1]} : vector<8x8xf32> to vector<1x8xf32>
    %311 = vector.extract_strided_slice %300 {offsets = [16, 0], sizes = [8, 4], strides = [1, 1]} : vector<64x4xf32> to vector<8x4xf32>
    %cst_121 = arith.constant dense<0.000000e+00> : vector<1x4xf32>
    %312 = tpu.matmul %310, %311, %cst_121 {dimension_numbers = #tpu.dot_dimension_numbers<[1], [0], [0], [1], [0, 0, 1, 1], [], []>} : vector<1x8xf32>, vector<8x4xf32>, vector<1x4xf32> -> vector<1x4xf32>
    %313 = arith.addf %309, %312 : vector<1x4xf32>
    %314 = vector.extract_strided_slice %229 {offsets = [3, 0], sizes = [1, 8], strides = [1, 1]} : vector<8x8xf32> to vector<1x8xf32>
    %315 = vector.extract_strided_slice %300 {offsets = [24, 0], sizes = [8, 4], strides = [1, 1]} : vector<64x4xf32> to vector<8x4xf32>
    %cst_122 = arith.constant dense<0.000000e+00> : vector<1x4xf32>
    %316 = tpu.matmul %314, %315, %cst_122 {dimension_numbers = #tpu.dot_dimension_numbers<[1], [0], [0], [1], [0, 0, 1, 1], [], []>} : vector<1x8xf32>, vector<8x4xf32>, vector<1x4xf32> -> vector<1x4xf32>
    %317 = arith.addf %313, %316 : vector<1x4xf32>
    %318 = vector.extract_strided_slice %229 {offsets = [4, 0], sizes = [1, 8], strides = [1, 1]} : vector<8x8xf32> to vector<1x8xf32>
    %319 = vector.extract_strided_slice %300 {offsets = [32, 0], sizes = [8, 4], strides = [1, 1]} : vector<64x4xf32> to vector<8x4xf32>
    %cst_123 = arith.constant dense<0.000000e+00> : vector<1x4xf32>
    %320 = tpu.matmul %318, %319, %cst_123 {dimension_numbers = #tpu.dot_dimension_numbers<[1], [0], [0], [1], [0, 0, 1, 1], [], []>} : vector<1x8xf32>, vector<8x4xf32>, vector<1x4xf32> -> vector<1x4xf32>
    %321 = arith.addf %317, %320 : vector<1x4xf32>
    %322 = vector.extract_strided_slice %229 {offsets = [5, 0], sizes = [1, 8], strides = [1, 1]} : vector<8x8xf32> to vector<1x8xf32>
    %323 = vector.extract_strided_slice %300 {offsets = [40, 0], sizes = [8, 4], strides = [1, 1]} : vector<64x4xf32> to vector<8x4xf32>
    %cst_124 = arith.constant dense<0.000000e+00> : vector<1x4xf32>
    %324 = tpu.matmul %322, %323, %cst_124 {dimension_numbers = #tpu.dot_dimension_numbers<[1], [0], [0], [1], [0, 0, 1, 1], [], []>} : vector<1x8xf32>, vector<8x4xf32>, vector<1x4xf32> -> vector<1x4xf32>
    %325 = arith.addf %321, %324 : vector<1x4xf32>
    %326 = vector.extract_strided_slice %229 {offsets = [6, 0], sizes = [1, 8], strides = [1, 1]} : vector<8x8xf32> to vector<1x8xf32>
    %327 = vector.extract_strided_slice %300 {offsets = [48, 0], sizes = [8, 4], strides = [1, 1]} : vector<64x4xf32> to vector<8x4xf32>
    %cst_125 = arith.constant dense<0.000000e+00> : vector<1x4xf32>
    %328 = tpu.matmul %326, %327, %cst_125 {dimension_numbers = #tpu.dot_dimension_numbers<[1], [0], [0], [1], [0, 0, 1, 1], [], []>} : vector<1x8xf32>, vector<8x4xf32>, vector<1x4xf32> -> vector<1x4xf32>
    %329 = arith.addf %325, %328 : vector<1x4xf32>
    %330 = vector.extract_strided_slice %229 {offsets = [7, 0], sizes = [1, 8], strides = [1, 1]} : vector<8x8xf32> to vector<1x8xf32>
    %331 = vector.extract_strided_slice %300 {offsets = [56, 0], sizes = [8, 4], strides = [1, 1]} : vector<64x4xf32> to vector<8x4xf32>
    %cst_126 = arith.constant dense<0.000000e+00> : vector<1x4xf32>
    %332 = tpu.matmul %330, %331, %cst_126 {dimension_numbers = #tpu.dot_dimension_numbers<[1], [0], [0], [1], [0, 0, 1, 1], [], []>} : vector<1x8xf32>, vector<8x4xf32>, vector<1x4xf32> -> vector<1x4xf32>
    %333 = arith.addf %329, %332 : vector<1x4xf32>
    %cst_127 = arith.constant 0.000000e+00 : f32
    %334 = vector.broadcast %cst_127 : f32 to vector<1x4xf32>
    %335 = arith.maximumf %333, %334 : vector<1x4xf32>
    %336 = arith.negf %335 : vector<1x4xf32>
    %337 = math.exp %336 : vector<1x4xf32>
    %cst_128 = arith.constant 1.000000e+00 : f32
    %338 = vector.broadcast %cst_128 : f32 to vector<1x4xf32>
    %339 = arith.addf %338, %337 : vector<1x4xf32>
    %340 = arith.divf %338, %339 : vector<1x4xf32>
    %c0_129 = arith.constant 0 : index
    %c0_130 = arith.constant 0 : index
    %341 = vector.load %arg19[%c0_129, %c0_130] : memref<2x4xf32, #tpu.memory_space<vmem>>, vector<1x4xf32>
    tpu.vector_store %arg19[%c0_129, %c0_130], %340 {strides = array<i32>} : memref<2x4xf32, #tpu.memory_space<vmem>>, vector<1x4xf32>,
    %342 = vector.extract_strided_slice %299 {offsets = [0, 0], sizes = [1, 8], strides = [1, 1]} : vector<8x8xf32> to vector<1x8xf32>
    %343 = vector.extract_strided_slice %300 {offsets = [0, 0], sizes = [8, 4], strides = [1, 1]} : vector<64x4xf32> to vector<8x4xf32>
    %cst_131 = arith.constant dense<0.000000e+00> : vector<1x4xf32>
    %344 = tpu.matmul %342, %343, %cst_131 {dimension_numbers = #tpu.dot_dimension_numbers<[1], [0], [0], [1], [0, 0, 1, 1], [], []>} : vector<1x8xf32>, vector<8x4xf32>, vector<1x4xf32> -> vector<1x4xf32>
    %345 = arith.addf %301, %344 : vector<1x4xf32>
    %346 = vector.extract_strided_slice %299 {offsets = [1, 0], sizes = [1, 8], strides = [1, 1]} : vector<8x8xf32> to vector<1x8xf32>
    %347 = vector.extract_strided_slice %300 {offsets = [8, 0], sizes = [8, 4], strides = [1, 1]} : vector<64x4xf32> to vector<8x4xf32>
    %cst_132 = arith.constant dense<0.000000e+00> : vector<1x4xf32>
    %348 = tpu.matmul %346, %347, %cst_132 {dimension_numbers = #tpu.dot_dimension_numbers<[1], [0], [0], [1], [0, 0, 1, 1], [], []>} : vector<1x8xf32>, vector<8x4xf32>, vector<1x4xf32> -> vector<1x4xf32>
    %349 = arith.addf %345, %348 : vector<1x4xf32>
    %350 = vector.extract_strided_slice %299 {offsets = [2, 0], sizes = [1, 8], strides = [1, 1]} : vector<8x8xf32> to vector<1x8xf32>
    %351 = vector.extract_strided_slice %300 {offsets = [16, 0], sizes = [8, 4], strides = [1, 1]} : vector<64x4xf32> to vector<8x4xf32>
    %cst_133 = arith.constant dense<0.000000e+00> : vector<1x4xf32>
    %352 = tpu.matmul %350, %351, %cst_133 {dimension_numbers = #tpu.dot_dimension_numbers<[1], [0], [0], [1], [0, 0, 1, 1], [], []>} : vector<1x8xf32>, vector<8x4xf32>, vector<1x4xf32> -> vector<1x4xf32>
    %353 = arith.addf %349, %352 : vector<1x4xf32>
    %354 = vector.extract_strided_slice %299 {offsets = [3, 0], sizes = [1, 8], strides = [1, 1]} : vector<8x8xf32> to vector<1x8xf32>
    %355 = vector.extract_strided_slice %300 {offsets = [24, 0], sizes = [8, 4], strides = [1, 1]} : vector<64x4xf32> to vector<8x4xf32>
    %cst_134 = arith.constant dense<0.000000e+00> : vector<1x4xf32>
    %356 = tpu.matmul %354, %355, %cst_134 {dimension_numbers = #tpu.dot_dimension_numbers<[1], [0], [0], [1], [0, 0, 1, 1], [], []>} : vector<1x8xf32>, vector<8x4xf32>, vector<1x4xf32> -> vector<1x4xf32>
    %357 = arith.addf %353, %356 : vector<1x4xf32>
    %358 = vector.extract_strided_slice %299 {offsets = [4, 0], sizes = [1, 8], strides = [1, 1]} : vector<8x8xf32> to vector<1x8xf32>
    %359 = vector.extract_strided_slice %300 {offsets = [32, 0], sizes = [8, 4], strides = [1, 1]} : vector<64x4xf32> to vector<8x4xf32>
    %cst_135 = arith.constant dense<0.000000e+00> : vector<1x4xf32>
    %360 = tpu.matmul %358, %359, %cst_135 {dimension_numbers = #tpu.dot_dimension_numbers<[1], [0], [0], [1], [0, 0, 1, 1], [], []>} : vector<1x8xf32>, vector<8x4xf32>, vector<1x4xf32> -> vector<1x4xf32>
    %361 = arith.addf %357, %360 : vector<1x4xf32>
    %362 = vector.extract_strided_slice %299 {offsets = [5, 0], sizes = [1, 8], strides = [1, 1]} : vector<8x8xf32> to vector<1x8xf32>
    %363 = vector.extract_strided_slice %300 {offsets = [40, 0], sizes = [8, 4], strides = [1, 1]} : vector<64x4xf32> to vector<8x4xf32>
    %cst_136 = arith.constant dense<0.000000e+00> : vector<1x4xf32>
    %364 = tpu.matmul %362, %363, %cst_136 {dimension_numbers = #tpu.dot_dimension_numbers<[1], [0], [0], [1], [0, 0, 1, 1], [], []>} : vector<1x8xf32>, vector<8x4xf32>, vector<1x4xf32> -> vector<1x4xf32>
    %365 = arith.addf %361, %364 : vector<1x4xf32>
    %366 = vector.extract_strided_slice %299 {offsets = [6, 0], sizes = [1, 8], strides = [1, 1]} : vector<8x8xf32> to vector<1x8xf32>
    %367 = vector.extract_strided_slice %300 {offsets = [48, 0], sizes = [8, 4], strides = [1, 1]} : vector<64x4xf32> to vector<8x4xf32>
    %cst_137 = arith.constant dense<0.000000e+00> : vector<1x4xf32>
    %368 = tpu.matmul %366, %367, %cst_137 {dimension_numbers = #tpu.dot_dimension_numbers<[1], [0], [0], [1], [0, 0, 1, 1], [], []>} : vector<1x8xf32>, vector<8x4xf32>, vector<1x4xf32> -> vector<1x4xf32>
    %369 = arith.addf %365, %368 : vector<1x4xf32>
    %370 = vector.extract_strided_slice %299 {offsets = [7, 0], sizes = [1, 8], strides = [1, 1]} : vector<8x8xf32> to vector<1x8xf32>
    %371 = vector.extract_strided_slice %300 {offsets = [56, 0], sizes = [8, 4], strides = [1, 1]} : vector<64x4xf32> to vector<8x4xf32>
    %cst_138 = arith.constant dense<0.000000e+00> : vector<1x4xf32>
    %372 = tpu.matmul %370, %371, %cst_138 {dimension_numbers = #tpu.dot_dimension_numbers<[1], [0], [0], [1], [0, 0, 1, 1], [], []>} : vector<1x8xf32>, vector<8x4xf32>, vector<1x4xf32> -> vector<1x4xf32>
    %373 = arith.addf %369, %372 : vector<1x4xf32>
    %cst_139 = arith.constant 0.000000e+00 : f32
    %374 = vector.broadcast %cst_139 : f32 to vector<1x4xf32>
    %375 = arith.maximumf %373, %374 : vector<1x4xf32>
    %376 = arith.negf %375 : vector<1x4xf32>
    %377 = math.exp %376 : vector<1x4xf32>
    %cst_140 = arith.constant 1.000000e+00 : f32
    %378 = vector.broadcast %cst_140 : f32 to vector<1x4xf32>
    %379 = arith.addf %378, %377 : vector<1x4xf32>
    %380 = arith.divf %378, %379 : vector<1x4xf32>
    %c1_141 = arith.constant 1 : index
    %c0_142 = arith.constant 0 : index
    %381 = vector.load %arg19[%c1_141, %c0_142] : memref<2x4xf32, #tpu.memory_space<vmem>>, vector<1x4xf32>
    tpu.vector_store %arg19[%c1_141, %c0_142], %380 {strides = array<i32>} : memref<2x4xf32, #tpu.memory_space<vmem>>, vector<1x4xf32>,
    return
  }
}

</mosaic_0001>

<bundles_post_ra>
// kernel: tpu_custom_call.1
= control target key start
LH: loop header
LB: loop body
LE: loop exit
PB: predicated region body
PF: predicated region fallthrough
CT: control target
= control target key end

     0   :  { %s2174_s0 = inlined_call_operand.vmem [shape: f32[2,8,32], index: 0, kind: input, shape index: {}]   ;;  %s2175_s1 = inlined_call_operand.vmem [shape: f32[32,96], index: 1, kind: input, shape index: {}]   ;;  %s2176_s2 = inlined_call_operand.vmem [shape: f32[1,96], index: 2, kind: input, shape index: {}]   ;;  %s2177_s3 = inlined_call_operand.vmem [shape: f32[32,32], index: 3, kind: input, shape index: {}]   ;;  %s2178_s4 = inlined_call_operand.vmem [shape: f32[1,32], index: 4, kind: input, shape index: {}]   ;;  %s2179_s5 = inlined_call_operand.vmem [shape: f32[1,32], index: 5, kind: input, shape index: {}]   ;;  %s2180_s6 = inlined_call_operand.vmem [shape: f32[1,32], index: 6, kind: input, shape index: {}]   ;;  %s2181_s7 = inlined_call_operand.vmem [shape: f32[32,16], index: 7, kind: input, shape index: {}]   ;;  %s2182_s8 = inlined_call_operand.vmem [shape: f32[1,16], index: 8, kind: input, shape index: {}]   ;;  %s2183_s9 = inlined_call_operand.vmem [shape: f32[16,48], index: 9, kind: input, shape index: {}]   ;;  %s2184_s10 = inlined_call_operand.vmem [shape: f32[1,48], index: 10, kind: input, shape index: {}]   ;;  %s2185_s11 = inlined_call_operand.vmem [shape: f32[16,16], index: 11, kind: input, shape index: {}]   ;;  %s2186_s12 = inlined_call_operand.vmem [shape: f32[1,16], index: 12, kind: input, shape index: {}]   ;;  %s2187_s13 = inlined_call_operand.vmem [shape: f32[1,16], index: 13, kind: input, shape index: {}]   ;;  %s2188_s14 = inlined_call_operand.vmem [shape: f32[1,16], index: 14, kind: input, shape index: {}]   ;;  %s2189_s15 = inlined_call_operand.vmem [shape: f32[16,8], index: 15, kind: input, shape index: {}]   ;;  %s2190_s16 = inlined_call_operand.vmem [shape: f32[1,8], index: 16, kind: input, shape index: {}]   ;;  %s2191_s17 = inlined_call_operand.vmem [shape: f32[64,4], index: 17, kind: input, shape index: {}]   ;;  %s2192_s18 = inlined_call_operand.vmem [shape: f32[1,4], index: 18, kind: input, shape index: {}]   ;;  %s2193_s19 = inlined_call_operand.hbm [shape: f32[2,4], index: 19, kind: output, shape index: {}]  }
   0x1   :  { %2197 = sst [smem:[#allocation5_spill]] %s2174_s0 }
   0x2   :  { %2198 = sst [smem:[#allocation6_spill]] %s2175_s1 }
   0x3   :  { %2199 = sst [smem:[#allocation7_spill]] %s2176_s2 }
   0x4   :  { %2200 = sst [smem:[#allocation8_spill]] %s2177_s3 }
   0x5   :  { %s2201_s20 = sld [smem:[#allocation6_spill]]  ;;  %vm86_vm0 = vcmask 261120  }
   0x6   :  { %s2202_s26 = sld [smem:[#allocation5_spill]] }
   0xb   :  { %v69_v0 = vld [vmem:[%s2201_s20 + $0x18] sm:$0xff]  ;;  %v68_v1 = vld [vmem:[%s2201_s20 + $0x10] sm:$0xff]  ;;  %v67_v2 = vld [vmem:[%s2201_s20 + $0x8] sm:$0xff] }
   0xc   :  { %102 = vmatpush.msra.mxu0 %v69_v0  ;;  %v66_v3 = vld [vmem:[%s2201_s20] sm:$0xff] }
   0xd   :  { %v1881_v4 = vld [vmem:[%s2202_s26] sm:$0xff] }
   0xe   :  { %103 = vmatpush.msra.mxu0 %v68_v1 }
  0x10   :  { %104 = vmatpush.msra.mxu0 %v67_v2 }
  0x11   :  { %24 = vsyncpa [#allocation3], 0  ;;  %s2203_s29 = sld [smem:[#allocation7_spill]]  ;;  %s1755_s0 = smov 80   ;;  %vm113_vm1 = vcmask 130048   ;;  %vm139_vm2 = vcmask 64512  }
  0x12   :  { %105 = vmatpush.msra.mxu0 %v66_v3  ;;  %s1756_s30 = smov 96   ;;  %s1757_s20 = smov 112   ;;  %v1909_v25 = vld [vmem:[%s2202_s26 + $0x8] sm:$0xff]  ;;  %v1945_v63 = vld [vmem:[%s2178_s4] ss:$0 sm:$0xff] }
  0x13   :  { %1598 = vmatmul.msk.f32.vlgmr.msra.gmra.mxu0 %vm86_vm0, %v1881_v4  ;;  %s1758_s21 = smov 48   ;;  %s1759_s1 = smov 64  }
  0x14   :  { %s2204_s23 = sld [smem:[#allocation8_spill]]  ;;  %s1763_s2 = smov 88  }
  0x15   :  { %s1588_s27 = sshll.u32 %s2193_s19, 4  ;;  %s1589_s27 = int_to_ptr.hbm [resolvable:$true] %s1588_s27 }
  0x17   :  { %v1667_v5 = vld [vmem:[%s2203_s29] ss:$0 sm:$0xff] }
  0x1a   :  { %v1900_v18 = vld [vmem:[%s2204_s23 + $0x8] sm:$0xff]  ;;  %v1916_v26 = vld [vmem:[%s2204_s23] sm:$0xff]  ;;  %v74_v43 = vld [vmem:[%s2204_s23 + $0x18] sm:$0xff] }
  0x1b   :  { %194 = vmatpush.msra.mxu3 %v1900_v18  ;;  %v73_v48 = vld [vmem:[%s2204_s23 + $0x10] sm:$0xff] }
  0x1d   :  { %195 = vmatpush.msra.mxu3 %v1916_v26 }
  0x1f   :  { %287 = vmatpush.msrb.mxu3 %v74_v43 }
  0x21   :  { %288 = vmatpush.msrb.mxu3 %v73_v48 }
  0x90   :  { %v107_v6 = vpop.f32.mrf.mxu0 }
  0x91   :  { %v108_v7 = vadd.f32 %v1667_v5, %v107_v6 }
  0x93   :  { %206 = vrot.lane.b32.xlu2 %v108_v7, %s1755_s0  ;;  %111 = vrot.lane.b32.xlu0 %v108_v7, %s1756_s30 }
  0x9b   :  { %204 = vrot.lane.b32.xlu2 %v108_v7, %s1757_s20 }
  0xed   :  { %v207_v21 = vpop.permute.xlu2 %206 }
  0xf5   :  { %v205_v24 = vpop.permute.xlu2 %204 }
 0x105   :  { %v112_v8 = vpop.permute.xlu0 %111 }
 0x106   :  { %1599 = vmatpush.xpose.msk.msra.mxu1 %vm113_vm1, %v112_v8 }
 0x109   :  { %1600 = vmatmul.msk.f32.vlgmr.msra.gmra.mxu1 %vm113_vm1, %v108_v7 }
 0x186   :  { %v135_v9 = vpop.f32.mrf.mxu1 }
 0x187   :  { %v138_v10 = vmul.f32 0.25, %v135_v9 }
 0x189   :  { %v140_v11 = vsel %vm139_vm2, %v138_v10, -inf }
 0x18a   :  { %141 = vmax.xlane.f32.xlu0 %v140_v11 }
 0x19e   :  { %244 = vrot.lane.b32.xlu0 %v108_v7, %s1758_s21 }
 0x1fd   :  { %v142_v12 = vpop.xlane.xlu0 %141 }
 0x1fe   :  { %v143_v13 = vsub.f32 %v138_v10, %v142_v12  ;;  %v1760_v12 = vmov 32.0  }
 0x200   :  { %v144_v14 = vmul.f32 1.442695, %v143_v13 }
 0x202   :  { %1677 = vpow2.f32 %v144_v14 }
 0x208   :  { %v1678_v15 = vpop.eup %1677 }
 0x209   :  { %v146_v16 = vsel %vm139_vm2, %v1678_v15, 0.0 }
 0x20a   :  { %147 = vadd.xlane.f32.xlu1 %v146_v16 }
 0x210   :  { %v245_v17 = vpop.permute.xlu0 %244 }
 0x211   :  { %265 = vmatpush.msrb.mxu1 %v245_v17 }
 0x223   :  { %151 = vrot.lane.b32.xlu1 %v108_v7, %s1759_s1 }
 0x27d   :  { %v148_v19 = vpop.xlane.xlu1 %147 }
 0x27e   :  { %1679 = vrcp.f32 %v148_v19 }
 0x284   :  { %v1680_v20 = vpop.eup %1679 }
 0x285   :  { %v150_v23 = vmul.f32 %v1680_v20, %v1678_v15 }
 0x295   :  { %v152_v22 = vpop.permute.xlu1 %151 }
 0x296   :  { %172 = vmatpush.msra.mxu2 %v152_v22 }
 0x297   :  { %1601 = vmatmul.msk.f32.vlgmr.msra.gmra.mxu2 %vm139_vm2, %v150_v23 }
 0x298   :  { %1603 = vmatpush.xpose.msk.msrb.mxu2 %vm113_vm1, %v207_v21 }
 0x29c   :  { %374 = vmatpush.msra.mxu2 %v69_v0 }
 0x29e   :  { %375 = vmatpush.msra.mxu2 %v68_v1 }
 0x29f   :  { %1604 = vmatmul.msk.f32.vlgmr.msrb.gmra.mxu2 %vm113_vm1, %v205_v24 }
 0x2a0   :  { %376 = vmatpush.msra.mxu2 %v67_v2 }
 0x2a2   :  { %377 = vmatpush.msra.mxu2 %v66_v3 }
 0x2a7   :  { %1608 = vmatmul.msk.f32.vlgmr.msra.gmra.mxu2 %vm86_vm0, %v1909_v25 }
 0x31a   :  { %v174_v27 = vpop.f32.mrf.mxu2 }
 0x31b   :  { %1602 = vmatmul.msk.f32.vlgmr.msra.gmra.mxu3 %vm113_vm1, %v174_v27 }
 0x322   :  { %v229_v28 = vpop.f32.mrf.mxu2 }
 0x323   :  { %v232_v29 = vmul.f32 0.25, %v229_v28 }
 0x325   :  { %v233_v30 = vsel %vm139_vm2, %v232_v29, -inf }
 0x326   :  { %234 = vmax.xlane.f32.xlu2 %v233_v30  ;;  %v81_v30 = vld [vmem:[%s2181_s7 + $0x18] sm:$0xff] }
 0x327   :  { %350 = vmatpush.msrb.mxu0 %v81_v30 }
 0x32a   :  { %v379_v31 = vpop.f32.mrf.mxu2 }
 0x32b   :  { %v380_v32 = vadd.f32 %v1667_v5, %v379_v31  ;;  %v80_v31 = vld [vmem:[%s2181_s7 + $0x10] sm:$0xff] }
 0x32c   :  { %351 = vmatpush.msrb.mxu0 %v80_v31 }
 0x32d   :  { %471 = vrot.lane.b32.xlu0 %v380_v32, %s1757_s20 }
 0x33e   :  { %473 = vrot.lane.b32.xlu2 %v380_v32, %s1755_s0 }
 0x399   :  { %v235_v33 = vpop.xlane.xlu2 %234 }
 0x39a   :  { %v236_v34 = vsub.f32 %v232_v29, %v235_v33  ;;  %v78_v33 = vld [vmem:[%s2181_s7] sm:$0xff] }
 0x39c   :  { %v237_v35 = vmul.f32 1.442695, %v236_v34 }
 0x39e   :  { %1681 = vpow2.f32 %v237_v35  ;;  %v197_v60 = vpop.f32.mrf.mxu3 }
 0x39f   :  { %v472_v37 = vpop.permute.xlu0 %471  ;;  %v203_v1 = vadd.f32 %v1945_v63, %v197_v60 }
 0x3a1   :  { %v474_v36 = vpop.permute.xlu2 %473 }
 0x3a2   :  { %1613 = vmatpush.xpose.msk.msrb.mxu2 %vm113_vm1, %v474_v36 }
 0x3a4   :  { %v1682_v38 = vpop.eup %1681 }
 0x3a5   :  { %1614 = vmatmul.msk.f32.vlgmr.msrb.gmra.mxu2 %vm113_vm1, %v472_v37  ;;  %v239_v39 = vsel %vm139_vm2, %v1682_v38, 0.0 }
 0x3a6   :  { %240 = vadd.xlane.f32.xlu1 %v239_v39 }
 0x3bf   :  { %383 = vrot.lane.b32.xlu1 %v380_v32, %s1756_s30 }
 0x419   :  { %v241_v40 = vpop.xlane.xlu1 %240 }
 0x41a   :  { %1683 = vrcp.f32 %v241_v40 }
 0x420   :  { %v1684_v41 = vpop.eup %1683 }
 0x421   :  { %v243_v42 = vmul.f32 %v1684_v41, %v1682_v38 }
 0x423   :  { %1605 = vmatmul.msk.f32.vlgmr.msrb.gmra.mxu1 %vm139_vm2, %v243_v42 }
 0x428   :  { %v496_v44 = vpop.f32.mrf.mxu2 }
 0x429   :  { %v499_v45 = vmul.f32 0.25, %v496_v44  ;;  %v1981_v44 = vld [vmem:[%s2180_s6] ss:$0 sm:$0xff] }
 0x42b   :  { %v500_v46 = vsel %vm139_vm2, %v499_v45, -inf }
 0x42c   :  { %501 = vmax.xlane.f32.xlu2 %v500_v46 }
 0x431   :  { %v384_v47 = vpop.permute.xlu1 %383 }
 0x432   :  { %1609 = vmatpush.xpose.msk.msra.mxu1 %vm113_vm1, %v384_v47 }
 0x435   :  { %1610 = vmatmul.msk.f32.vlgmr.msra.gmra.mxu1 %vm113_vm1, %v380_v32 }
 0x444   :  { %421 = vrot.lane.b32.xlu2 %v380_v32, %s1759_s1 }
 0x49f   :  { %v502_v49 = vpop.xlane.xlu2 %501 }
 0x4a0   :  { %v267_v50 = vpop.f32.mrf.mxu1  ;;  %v503_v52 = vsub.f32 %v499_v45, %v502_v49  ;;  %v610_v49 = vld [vmem:[%s2183_s9] sm:$0xff] }
 0x4a1   :  { %1606 = vmatmul.msk.f32.vlgmr.msrb.gmra.mxu3 %vm113_vm1, %v267_v50  ;;  %v1671_v50 = vld [vmem:[%s2182_s8] ss:$0 sm:$0xff] }
 0x4a2   :  { %v504_v53 = vmul.f32 1.442695, %v503_v52 }
 0x4a4   :  { %1685 = vpow2.f32 %v504_v53 }
 0x4a7   :  { %v422_v51 = vpop.permute.xlu2 %421 }
 0x4a8   :  { %442 = vmatpush.msra.mxu3 %v422_v51 }
 0x4aa   :  { %554 = vmatpush.msrb.mxu3 %v74_v43  ;;  %v1686_v57 = vpop.eup %1685 }
 0x4ab   :  { %v506_v58 = vsel %vm139_vm2, %v1686_v57, 0.0 }
 0x4ac   :  { %555 = vmatpush.msrb.mxu3 %v73_v48  ;;  %v611_v48 = vld [vmem:[%s2183_s9 + $0x8] sm:$0xff] }
 0x4ad   :  { %641 = vmatpush.msra.mxu2 %v611_v48 }
 0x4af   :  { %642 = vmatpush.msra.mxu2 %v610_v49 }
 0x4b2   :  { %v406_v54 = vpop.f32.mrf.mxu1 }
 0x4b3   :  { %v409_v55 = vmul.f32 0.25, %v406_v54 }
 0x4b5   :  { %v410_v56 = vsel %vm139_vm2, %v409_v55, -inf }
 0x4b6   :  { %411 = vmax.xlane.f32.xlu0 %v410_v56 }
 0x4be   :  { %507 = vadd.xlane.f32.xlu0 %v506_v58 }
 0x4d2   :  { %511 = vrot.lane.b32.xlu0 %v380_v32, %s1758_s21  ;;  %v79_v32 = vld [vmem:[%s2181_s7 + $0x8] sm:$0xff]  ;;  %s1761_s21 = smov 104  }
 0x4d3   :  { %352 = vmatpush.msrb.mxu0 %v79_v32 }
 0x4d5   :  { %353 = vmatpush.msrb.mxu0 %v78_v33 }
 0x4d7   :  { %464 = vmatpush.msra.mxu0 %v1900_v18  ;;  %v1976_v18 = vld [vmem:[%s2179_s5] ss:$0 sm:$0xff] }
 0x4d9   :  { %465 = vmatpush.msra.mxu0 %v1916_v26 }
 0x524   :  { %v290_v0 = vpop.f32.mrf.mxu3 }
 0x525   :  { %v293_v3 = vadd.f32 %v290_v0, %v203_v1 }
 0x527   :  { %v294_v7 = vadd.f32 %v293_v3, %v1881_v4 }
 0x529   :  { %v412_v59 = vpop.xlane.xlu0 %411  ;;  %v295_v8 = vsel %vm86_vm0, %v294_v7, 0.0 }
 0x52a   :  { %v413_v61 = vsub.f32 %v409_v55, %v412_v59 }
 0x52c   :  { %v414_v62 = vmul.f32 1.442695, %v413_v61 }
 0x52e   :  { %1687 = vpow2.f32 %v414_v62  ;;  %v2009_v62 = vld [vmem:[%s2184_s10] ss:$0 sm:$0xff]  ;;  %s1762_s10 = smov 120  }
 0x531   :  { %v508_v6 = vpop.xlane.xlu0 %507 }
 0x532   :  { %1689 = vrcp.f32 %v508_v6 }
 0x533   :  { %1691 = vrcp.f32 %v1760_v12 }
 0x534   :  { %v1688_v2 = vpop.eup %1687 }
 0x535   :  { %v416_v5 = vsel %vm139_vm2, %v1688_v2, 0.0 }
 0x536   :  { %417 = vadd.xlane.f32.xlu1 %v416_v5 }
 0x538   :  { %v1690_v9 = vpop.eup %1689 }
 0x539   :  { %v510_v10 = vmul.f32 %v1690_v9, %v1686_v57  ;;  %v1692_v13 = vpop.eup %1691 }
 0x53a   :  { %v299_v14 = vmul.f32 32.0, %v1692_v13  ;;  %vm303_vm3 = vweird.f32 %v1692_v13 }
 0x53c   :  { %v300_v15 = vsub.f32 1.0, %v299_v14 }
 0x53e   :  { %296 = vadd.xlane.f32.xlu1 %v295_v8  ;;  %v301_v16 = vmul.f32 %v1692_v13, %v300_v15 }
 0x540   :  { %v302_v19 = vadd.f32 %v1692_v13, %v301_v16 }
 0x542   :  { %v1952_v4 = vsel %vm303_vm3, %v1692_v13, %v302_v19 }
 0x544   :  { %v512_v11 = vpop.permute.xlu0 %511 }
 0x545   :  { %532 = vmatpush.msrb.mxu1 %v512_v11 }
 0x546   :  { %1615 = vmatmul.msk.f32.vlgmr.msrb.gmra.mxu1 %vm139_vm2, %v510_v10 }
 0x5a9   :  { %v418_v17 = vpop.xlane.xlu1 %417 }
 0x5aa   :  { %1693 = vrcp.f32 %v418_v17 }
 0x5b0   :  { %v1694_v20 = vpop.eup %1693 }
 0x5b1   :  { %v420_v21 = vmul.f32 %v1694_v20, %v1688_v2  ;;  %v297_v22 = vpop.xlane.xlu1 %296 }
 0x5b2   :  { %v305_v23 = vmul.f32 %v1952_v4, %v297_v22 }
 0x5b3   :  { %1611 = vmatmul.msk.f32.vlgmr.msra.gmra.mxu3 %vm139_vm2, %v420_v21 }
 0x5b4   :  { %v306_v24 = vsub.f32 %v294_v7, %v305_v23 }
 0x5b6   :  { %v307_v27 = vmul.f32 %v306_v24, %v306_v24 }
 0x5b8   :  { %v308_v28 = vsel %vm86_vm0, %v307_v27, 0.0 }
 0x5b9   :  { %309 = vadd.xlane.f32.xlu2 %v308_v28 }
 0x5c3   :  { %v534_v29 = vpop.f32.mrf.mxu1 }
 0x5c4   :  { %1616 = vmatmul.msk.f32.vlgmr.msrb.gmra.mxu3 %vm113_vm1, %v534_v29 }
 0x62c   :  { %v310_v34 = vpop.xlane.xlu2 %309 }
 0x62d   :  { %v311_v35 = vmul.f32 %v310_v34, %v1952_v4 }
 0x62f   :  { %v312_v36 = vadd.f32 1e-05, %v311_v35 }
 0x631   :  { %1695 = vrsqrt.f32 %v312_v36  ;;  %vm319_vm5 = vweird.f32 %v312_v36 }
 0x636   :  { %v444_v47 = vpop.f32.mrf.mxu3 }
 0x637   :  { %v1696_v37 = vpop.eup %1695 }
 0x638   :  { %v314_v38 = vmul.f32 %v1696_v37, %v312_v36  ;;  %vm320_vm4 = vweird.f32 %v1696_v37 }
 0x639   :  { %vm321_vm6 = vmor %vm319_vm5, %vm320_vm4 }
 0x63a   :  { %v315_v39 = vmul.f32 %v1696_v37, %v314_v38 }
 0x63c   :  { %v316_v40 = vmul.f32 0.5, %v315_v39 }
 0x63e   :  { %v317_v41 = vsub.f32 1.5, %v316_v40 }
 0x640   :  { %v318_v42 = vmul.f32 %v1696_v37, %v317_v41 }
 0x642   :  { %v322_v43 = vsel %vm321_vm6, %v1696_v37, %v318_v42 }
 0x643   :  { %v323_v26 = vmul.f32 %v322_v43, %v306_v24 }
 0x645   :  { %v327_v45 = vmul.f32 %v1976_v18, %v323_v26 }
 0x647   :  { %v331_v46 = vadd.f32 %v1981_v44, %v327_v45  ;;  %v557_v56 = vpop.f32.mrf.mxu3 }
 0x649   :  { %1607 = vmatmul.msk.f32.vlgmr.msrb.gmra.mxu0 %vm86_vm0, %v331_v46 }
 0x64a   :  { %601 = vmatpush.msrb.mxu0 %v81_v30 }
 0x64c   :  { %602 = vmatpush.msrb.mxu0 %v80_v31 }
 0x64e   :  { %603 = vmatpush.msrb.mxu0 %v79_v32 }
 0x650   :  { %604 = vmatpush.msrb.mxu0 %v78_v33 }
 0x651   :  { %1612 = vmatmul.msk.f32.vlgmr.msra.gmra.mxu0 %vm113_vm1, %v444_v47 }
 0x6c6   :  { %v355_v51 = vpop.f32.mrf.mxu0 }
 0x6c7   :  { %v1996_v52 = vadd.f32 %v1671_v50, %v355_v51 }
 0x6c9   :  { %v358_v53 = vmax.f32 %v1996_v52, 0.0 }
 0x6cb   :  { %1618 = vmatmul.msk.f32.vlgmr.msra.gmra.mxu2 %vm113_vm1, %v358_v53 }
 0x6ce   :  { %v467_v54 = vpop.f32.mrf.mxu0 }
 0x6cf   :  { %v470_v55 = vadd.f32 %v1945_v63, %v467_v54  ;;  %v2057_v54 = vld [vmem:[%s2185_s11] sm:$0xff] }
 0x6d0   :  { %730 = vmatpush.msra.mxu0 %v2057_v54 }
 0x6d1   :  { %v560_v57 = vadd.f32 %v557_v56, %v470_v55 }
 0x6d3   :  { %v561_v58 = vadd.f32 %v1909_v25, %v560_v57 }
 0x6d5   :  { %v562_v59 = vsel %vm86_vm0, %v561_v58, 0.0 }
 0x6d6   :  { %563 = vadd.xlane.f32.xlu0 %v562_v59 }
 0x749   :  { %v564_v60 = vpop.xlane.xlu0 %563 }
 0x74a   :  { %v565_v61 = vmul.f32 %v564_v60, %v1952_v4 }
 0x74c   :  { %v566_v0 = vsub.f32 %v561_v58, %v565_v61  ;;  %v614_v58 = vld [vmem:[%s2185_s11 + $0x8] sm:$0xff] }
 0x74e   :  { %v644_v1 = vpop.f32.mrf.mxu2  ;;  %v567_v2 = vmul.f32 %v566_v0, %v566_v0 }
 0x74f   :  { %v2012_v63 = vadd.f32 %v2009_v62, %v644_v1 }
 0x750   :  { %v568_v3 = vsel %vm86_vm0, %v567_v2, 0.0 }
 0x751   :  { %648 = vrot.lane.b32.xlu2 %v2012_v63, %s1757_s20  ;;  %569 = vadd.xlane.f32.xlu1 %v568_v3 }
 0x759   :  { %686 = vrot.lane.b32.xlu2 %v2012_v63, %s1756_s30 }
 0x76a   :  { %741 = vrot.lane.b32.xlu1 %v2012_v63, %s1761_s21 }
 0x772   :  { %739 = vrot.lane.b32.xlu1 %v2012_v63, %s1762_s10 }
 0x7ab   :  { %v649_v25 = vpop.permute.xlu2 %648 }
 0x7ac   :  { %1619 = vmatpush.xpose.msk.msra.mxu1 %vm139_vm2, %v649_v25 }
 0x7af   :  { %1620 = vmatmul.msk.f32.vlgmr.msra.gmra.mxu1 %vm139_vm2, %v2012_v63 }
 0x7b3   :  { %v687_v5 = vpop.permute.xlu2 %686 }
 0x7b4   :  { %707 = vmatpush.msra.mxu3 %v687_v5 }
 0x7b6   :  { %823 = vmatpush.msrb.mxu3 %v614_v58 }
 0x7c4   :  { %v570_v6 = vpop.xlane.xlu1 %569 }
 0x7c5   :  { %v571_v7 = vmul.f32 %v570_v6, %v1952_v4 }
 0x7c7   :  { %v572_v8 = vadd.f32 1e-05, %v571_v7 }
 0x7c9   :  { %1697 = vrsqrt.f32 %v572_v8  ;;  %vm579_vm8 = vweird.f32 %v572_v8 }
 0x7cf   :  { %v1698_v9 = vpop.eup %1697 }
 0x7d0   :  { %v574_v10 = vmul.f32 %v1698_v9, %v572_v8  ;;  %vm580_vm7 = vweird.f32 %v1698_v9 }
 0x7d1   :  { %vm581_vm9 = vmor %vm579_vm8, %vm580_vm7 }
 0x7d2   :  { %v575_v11 = vmul.f32 %v1698_v9, %v574_v10 }
 0x7d4   :  { %v576_v12 = vmul.f32 0.5, %v575_v11 }
 0x7d6   :  { %v577_v13 = vsub.f32 1.5, %v576_v12 }
 0x7d8   :  { %v578_v14 = vmul.f32 %v1698_v9, %v577_v13 }
 0x7da   :  { %v582_v15 = vsel %vm581_vm9, %v1698_v9, %v578_v14  ;;  %v2073_v9 = vld [vmem:[%s2186_s12] ss:$0 sm:$0xff] }
 0x7db   :  { %v583_v16 = vmul.f32 %v582_v15, %v566_v0 }
 0x7dc   :  { %v742_v17 = vpop.permute.xlu1 %741 }
 0x7dd   :  { %v584_v19 = vmul.f32 %v1976_v18, %v583_v16  ;;  %1623 = vmatpush.xpose.msk.msrb.mxu2 %vm139_vm2, %v742_v17 }
 0x7df   :  { %v585_v4 = vadd.f32 %v1981_v44, %v584_v19 }
 0x7e1   :  { %911 = vmatpush.msra.mxu2 %v611_v48  ;;  %1617 = vmatmul.msk.f32.vlgmr.msrb.gmra.mxu0 %vm86_vm0, %v585_v4 }
 0x7e3   :  { %912 = vmatpush.msra.mxu2 %v610_v49 }
 0x7e4   :  { %v740_v20 = vpop.permute.xlu1 %739 }
 0x7e5   :  { %1624 = vmatmul.msk.f32.vlgmr.msrb.gmra.mxu2 %vm139_vm2, %v740_v20 }
 0x82c   :  { %v671_v21 = vpop.f32.mrf.mxu1 }
 0x82d   :  { %v674_v22 = vmul.f32 0.35355338, %v671_v21 }
 0x82f   :  { %v675_v23 = vsel %vm139_vm2, %v674_v22, -inf }
 0x830   :  { %676 = vmax.xlane.f32.xlu0 %v675_v23 }
 0x85e   :  { %v606_v24 = vpop.f32.mrf.mxu0 }
 0x85f   :  { %v2033_v27 = vadd.f32 %v1671_v50, %v606_v24 }
 0x861   :  { %v609_v28 = vmax.f32 %v2033_v27, 0.0  ;;  %v1148_v27 = vld [vmem:[%s2191_s17 + $0x18] sm:$0xff] }
 0x863   :  { %1628 = vmatmul.msk.f32.vlgmr.msra.gmra.mxu2 %vm113_vm1, %v609_v28 }
 0x868   :  { %v764_v29 = vpop.f32.mrf.mxu2 }
 0x869   :  { %v767_v30 = vmul.f32 0.35355338, %v764_v29 }
 0x86b   :  { %v768_v31 = vsel %vm139_vm2, %v767_v30, -inf }
 0x86c   :  { %769 = vmax.xlane.f32.xlu1 %v768_v31 }
 0x8a3   :  { %v677_v32 = vpop.xlane.xlu0 %676 }
 0x8a4   :  { %v678_v33 = vsub.f32 %v674_v22, %v677_v32  ;;  %v1764_v22 = vmov 16.0  }
 0x8a6   :  { %v679_v34 = vmul.f32 1.442695, %v678_v33 }
 0x8a8   :  { %1699 = vpow2.f32 %v679_v34 }
 0x8ae   :  { %v1700_v35 = vpop.eup %1699 }
 0x8af   :  { %v681_v36 = vsel %vm139_vm2, %v1700_v35, 0.0 }
 0x8b0   :  { %682 = vadd.xlane.f32.xlu0 %v681_v36 }
 0x8df   :  { %v770_v37 = vpop.xlane.xlu1 %769 }
 0x8e0   :  { %v771_v38 = vsub.f32 %v767_v30, %v770_v37 }
 0x8e2   :  { %v772_v39 = vmul.f32 1.442695, %v771_v38 }
 0x8e4   :  { %1701 = vpow2.f32 %v772_v39 }
 0x8e6   :  { %v914_v40 = vpop.f32.mrf.mxu2 }
 0x8e7   :  { %v915_v41 = vadd.f32 %v2009_v62, %v914_v40  ;;  %v619_v40 = vld [vmem:[%s2189_s15 + $0x8] sm:$0xff] }
 0x8e8   :  { %887 = vmatpush.msrb.mxu0 %v619_v40 }
 0x8e9   :  { %1008 = vrot.lane.b32.xlu2 %v915_v41, %s1761_s21  ;;  %918 = vrot.lane.b32.xlu1 %v915_v41, %s1757_s20 }
 0x8ea   :  { %v1702_v42 = vpop.eup %1701 }
 0x8eb   :  { %v774_v18 = vsel %vm139_vm2, %v1702_v42, 0.0 }
 0x8ec   :  { %775 = vadd.xlane.f32.xlu0 %v774_v18 }
 0x8f1   :  { %1006 = vrot.lane.b32.xlu2 %v915_v41, %s1762_s10 }
 0x900   :  { %779 = vrot.lane.b32.xlu0 %v2012_v63, %s1763_s2 }
 0x923   :  { %v683_v43 = vpop.xlane.xlu0 %682 }
 0x924   :  { %1703 = vrcp.f32 %v683_v43 }
 0x92a   :  { %v1704_v26 = vpop.eup %1703 }
 0x92b   :  { %v685_v44 = vmul.f32 %v1704_v26, %v1700_v35 }
 0x92d   :  { %1621 = vmatmul.msk.f32.vlgmr.msra.gmra.mxu3 %vm139_vm2, %v685_v44 }
 0x943   :  { %v1009_v45 = vpop.permute.xlu2 %1008 }
 0x944   :  { %1633 = vmatpush.xpose.msk.msrb.mxu2 %vm139_vm2, %v1009_v45 }
 0x94b   :  { %v1007_v46 = vpop.permute.xlu2 %1006 }
 0x94c   :  { %1634 = vmatmul.msk.f32.vlgmr.msrb.gmra.mxu2 %vm139_vm2, %v1007_v46 }
 0x95b   :  { %v919_v51 = vpop.permute.xlu1 %918 }
 0x95f   :  { %v776_v47 = vpop.xlane.xlu0 %775 }
 0x960   :  { %1705 = vrcp.f32 %v776_v47 }
 0x966   :  { %v1706_v48 = vpop.eup %1705 }
 0x967   :  { %v778_v49 = vmul.f32 %v1706_v48, %v1702_v42 }
 0x972   :  { %v780_v50 = vpop.permute.xlu0 %779 }
 0x973   :  { %800 = vmatpush.msrb.mxu1 %v780_v50 }
 0x974   :  { %1625 = vmatmul.msk.f32.vlgmr.msrb.gmra.mxu1 %vm139_vm2, %v778_v49  ;;  %v2098_v49 = vld [vmem:[%s2187_s13] ss:$0 sm:$0xff] }
 0x975   :  { %1629 = vmatpush.xpose.msk.msra.mxu1 %vm139_vm2, %v919_v51 }
 0x97c   :  { %1630 = vmatmul.msk.f32.vlgmr.msra.gmra.mxu1 %vm139_vm2, %v915_v41 }
 0x9b0   :  { %v709_v55 = vpop.f32.mrf.mxu3 }
 0x9b1   :  { %1622 = vmatmul.msk.f32.vlgmr.msra.gmra.mxu0 %vm139_vm2, %v709_v55 }
 0x9cf   :  { %v1031_v56 = vpop.f32.mrf.mxu2 }
 0x9d0   :  { %v1034_v57 = vmul.f32 0.35355338, %v1031_v56 }
 0x9d2   :  { %v1035_v59 = vsel %vm139_vm2, %v1034_v57, -inf }
 0x9d3   :  { %1036 = vmax.xlane.f32.xlu2 %v1035_v59  ;;  %v1146_v59 = vld [vmem:[%s2191_s17 + $0x8] sm:$0xff] }
 0x9eb   :  { %956 = vrot.lane.b32.xlu2 %v915_v41, %s1756_s30 }
 0x9f1   :  { %v802_v60 = vpop.f32.mrf.mxu1 }
 0x9f2   :  { %1626 = vmatmul.msk.f32.vlgmr.msrb.gmra.mxu3 %vm139_vm2, %v802_v60  ;;  %v1147_v60 = vld [vmem:[%s2191_s17 + $0x10] sm:$0xff] }
 0x9f9   :  { %v941_v61 = vpop.f32.mrf.mxu1 }
 0x9fa   :  { %v944_v62 = vmul.f32 0.35355338, %v941_v61  ;;  %v1149_v61 = vld [vmem:[%s2191_s17 + $0x20] sm:$0xff] }
 0x9fc   :  { %v945_v0 = vsel %vm139_vm2, %v944_v62, -inf }
 0x9fd   :  { %946 = vmax.xlane.f32.xlu0 %v945_v0  ;;  %v1151_v0 = vld [vmem:[%s2191_s17 + $0x30] sm:$0xff] }
 0xa2e   :  { %v732_v10 = vpop.f32.mrf.mxu0 }
 0xa2f   :  { %v738_v12 = vadd.f32 %v2073_v9, %v732_v10 }
 0xa46   :  { %v1037_v1 = vpop.xlane.xlu2 %1036 }
 0xa47   :  { %v1038_v2 = vsub.f32 %v1034_v57, %v1037_v1  ;;  %v2130_v1 = vld [vmem:[%s2190_s16] ss:$0 sm:$0xff] }
 0xa49   :  { %v1039_v63 = vmul.f32 1.442695, %v1038_v2 }
 0xa4b   :  { %1707 = vpow2.f32 %v1039_v63 }
 0xa4e   :  { %v957_v3 = vpop.permute.xlu2 %956 }
 0xa4f   :  { %977 = vmatpush.msra.mxu3 %v957_v3 }
 0xa51   :  { %1090 = vmatpush.msrb.mxu3 %v614_v58  ;;  %v1708_v25 = vpop.eup %1707  ;;  %v1145_v58 = vld [vmem:[%s2191_s17] sm:$0xff] }
 0xa52   :  { %v1041_v5 = vsel %vm139_vm2, %v1708_v25, 0.0  ;;  %1172 = vmatpush.msra.mxu2 %v1145_v58 }
 0xa53   :  { %1042 = vadd.xlane.f32.xlu0 %v1041_v5 }
 0xa54   :  { %1268 = vmatpush.msrb.mxu2 %v1149_v61 }
 0xa67   :  { %1046 = vrot.lane.b32.xlu0 %v915_v41, %s1763_s2  ;;  %v618_v41 = vld [vmem:[%s2189_s15] sm:$0xff] }
 0xa68   :  { %888 = vmatpush.msrb.mxu0 %v618_v41 }
 0xa6a   :  { %1000 = vmatpush.msra.mxu0 %v2057_v54  ;;  %v2103_v54 = vld [vmem:[%s2188_s14] ss:$0 sm:$0xff] }
 0xa70   :  { %v947_v6 = vpop.xlane.xlu0 %946 }
 0xa71   :  { %v948_v7 = vsub.f32 %v944_v62, %v947_v6  ;;  %v1150_v62 = vld [vmem:[%s2191_s17 + $0x28] sm:$0xff] }
 0xa73   :  { %v949_v8 = vmul.f32 1.442695, %v948_v7 }
 0xa75   :  { %1709 = vpow2.f32 %v949_v8  ;;  %v825_v11 = vpop.f32.mrf.mxu3 }
 0xa76   :  { %v828_v14 = vadd.f32 %v825_v11, %v738_v12 }
 0xa78   :  { %v829_v16 = vadd.f32 %v828_v14, %v358_v53 }
 0xa7a   :  { %v830_v17 = vsel %vm113_vm1, %v829_v16, 0.0 }
 0xa7b   :  { %v1710_v13 = vpop.eup %1709 }
 0xa7c   :  { %v951_v15 = vsel %vm139_vm2, %v1710_v13, 0.0 }
 0xa7d   :  { %952 = vadd.xlane.f32.xlu1 %v951_v15 }
 0xa85   :  { %831 = vadd.xlane.f32.xlu1 %v830_v17 }
 0xac6   :  { %v1043_v19 = vpop.xlane.xlu0 %1042 }
 0xac7   :  { %1711 = vrcp.f32 %v1043_v19 }
 0xac8   :  { %1713 = vrcp.f32 %v1764_v22 }
 0xacd   :  { %v1712_v4 = vpop.eup %1711 }
 0xace   :  { %v1045_v20 = vmul.f32 %v1712_v4, %v1708_v25  ;;  %v1714_v23 = vpop.eup %1713 }
 0xacf   :  { %v834_v24 = vmul.f32 16.0, %v1714_v23  ;;  %vm838_vm10 = vweird.f32 %v1714_v23 }
 0xad1   :  { %v835_v29 = vsub.f32 1.0, %v834_v24 }
 0xad3   :  { %v836_v30 = vmul.f32 %v1714_v23, %v835_v29 }
 0xad5   :  { %v837_v52 = vadd.f32 %v1714_v23, %v836_v30 }
 0xad7   :  { %v2081_v53 = vsel %vm838_vm10, %v1714_v23, %v837_v52 }
 0xad9   :  { %v1047_v21 = vpop.permute.xlu0 %1046 }
 0xada   :  { %1067 = vmatpush.msrb.mxu1 %v1047_v21 }
 0xadb   :  { %1635 = vmatmul.msk.f32.vlgmr.msrb.gmra.mxu1 %vm139_vm2, %v1045_v20 }
 0xadc   :  { %1196 = vmatpush.msra.mxu1 %v1146_v59 }
 0xade   :  { %1292 = vmatpush.msrb.mxu1 %v1150_v62 }
 0xaf0   :  { %v953_v31 = vpop.xlane.xlu1 %952 }
 0xaf1   :  { %1715 = vrcp.f32 %v953_v31 }
 0xaf7   :  { %v1716_v32 = vpop.eup %1715 }
 0xaf8   :  { %v955_v33 = vmul.f32 %v1716_v32, %v1710_v13  ;;  %v832_v34 = vpop.xlane.xlu1 %831 }
 0xaf9   :  { %v840_v35 = vmul.f32 %v2081_v53, %v832_v34 }
 0xafa   :  { %1631 = vmatmul.msk.f32.vlgmr.msra.gmra.mxu3 %vm139_vm2, %v955_v33 }
 0xafb   :  { %v841_v36 = vsub.f32 %v829_v16, %v840_v35  ;;  %1220 = vmatpush.msra.mxu3 %v1147_v60 }
 0xafd   :  { %v842_v37 = vmul.f32 %v841_v36, %v841_v36 }
 0xaff   :  { %v843_v38 = vsel %vm113_vm1, %v842_v37, 0.0  ;;  %v1153_v37 = vld [vmem:[%s2192_s18] sm:$0x1] }
 0xb00   :  { %844 = vadd.xlane.f32.xlu2 %v843_v38 }
 0xb58   :  { %v1069_v39 = vpop.f32.mrf.mxu1 }
 0xb59   :  { %1636 = vmatmul.msk.f32.vlgmr.msrb.gmra.mxu3 %vm139_vm2, %v1069_v39 }
 0xb5a   :  { %1316 = vmatpush.msrb.mxu3 %v1151_v0 }
 0xb73   :  { %v845_v42 = vpop.xlane.xlu2 %844 }
 0xb74   :  { %v846_v18 = vmul.f32 %v845_v42, %v2081_v53 }
 0xb76   :  { %v847_v43 = vadd.f32 1e-05, %v846_v18 }
 0xb78   :  { %1717 = vrsqrt.f32 %v847_v43  ;;  %vm854_vm12 = vweird.f32 %v847_v43 }
 0xb7d   :  { %v979_v57 = vpop.f32.mrf.mxu3 }
 0xb7e   :  { %v1718_v26 = vpop.eup %1717 }
 0xb7f   :  { %v849_v44 = vmul.f32 %v1718_v26, %v847_v43  ;;  %vm855_vm11 = vweird.f32 %v1718_v26 }
 0xb80   :  { %vm856_vm13 = vmor %vm854_vm12, %vm855_vm11 }
 0xb81   :  { %v850_v45 = vmul.f32 %v1718_v26, %v849_v44 }
 0xb83   :  { %v851_v46 = vmul.f32 0.5, %v850_v45 }
 0xb85   :  { %v852_v47 = vsub.f32 1.5, %v851_v46 }
 0xb87   :  { %v853_v48 = vmul.f32 %v1718_v26, %v852_v47 }
 0xb89   :  { %v857_v50 = vsel %vm856_vm13, %v1718_v26, %v853_v48 }
 0xb8a   :  { %v858_v51 = vmul.f32 %v857_v50, %v841_v36 }
 0xb8c   :  { %v862_v55 = vmul.f32 %v2098_v49, %v858_v51 }
 0xb8e   :  { %v866_v56 = vadd.f32 %v2103_v54, %v862_v55 }
 0xb90   :  { %1627 = vmatmul.msk.f32.vlgmr.msrb.gmra.mxu0 %vm113_vm1, %v866_v56 }
 0xb91   :  { %1138 = vmatpush.msrb.mxu0 %v619_v40 }
 0xb93   :  { %1139 = vmatpush.msrb.mxu0 %v618_v41 }
 0xb98   :  { %1632 = vmatmul.msk.f32.vlgmr.msra.gmra.mxu0 %vm139_vm2, %v979_v57 }
 0xb99   :  { %1244 = vmatpush.msra.mxu0 %v1148_v27 }
 0xbdc   :  { %v1092_v8 = vpop.f32.mrf.mxu3 }
 0xc0d   :  { %v890_v2 = vpop.f32.mrf.mxu0 }
 0xc0e   :  { %v891_v63 = vadd.f32 %v2130_v1, %v890_v2 }
 0xc10   :  { %v893_v3 = vmax.f32 %v891_v63, 0.0 }
 0xc12   :  { %1638 = vmatmul.msk.f32.vlgmr.msra.gmra.mxu2 %vm139_vm2, %v893_v3  ;;  %v1178_v25 = vrot.slane %v893_v3, 1  ;;  %v1202_v5 = vrot.slane %v893_v3, 2  ;;  %v1250_v11 = vrot.slane %v893_v3, 4  ;;  %v1274_v12 = vrot.slane %v893_v3, 5 }
 0xc13   :  { %1386 = vmatpush.msra.mxu2 %v1145_v58  ;;  %v1298_v13 = vrot.slane %v893_v3, 6  ;;  %v1226_v35 = vrot.slane %v893_v3, 3  ;;  %v1322_v36 = vrot.slane %v893_v3, 7 }
 0xc14   :  { %1639 = vmatmul.msk.f32.vlgmr.msra.gmra.mxu1 %vm139_vm2, %v1178_v25  ;;  %1640 = vmatmul.msk.f32.vlgmr.msra.gmra.mxu3 %vm139_vm2, %v1202_v5 }
 0xc15   :  { %v1002_v6 = vpop.f32.mrf.mxu0  ;;  %1410 = vmatpush.msra.mxu1 %v1146_v59  ;;  %1434 = vmatpush.msra.mxu3 %v1147_v60 }
 0xc16   :  { %v1005_v7 = vadd.f32 %v2073_v9, %v1002_v6 }
 0xc18   :  { %v1095_v10 = vadd.f32 %v1092_v8, %v1005_v7 }
 0xc1a   :  { %1642 = vmatmul.msk.f32.vlgmr.msrb.gmra.mxu2 %vm139_vm2, %v1250_v11  ;;  %v1096_v14 = vadd.f32 %v1095_v10, %v609_v28 }
 0xc1b   :  { %1482 = vmatpush.msrb.mxu2 %v1149_v61 }
 0xc1c   :  { %1643 = vmatmul.msk.f32.vlgmr.msrb.gmra.mxu1 %vm139_vm2, %v1274_v12  ;;  %1644 = vmatmul.msk.f32.vlgmr.msrb.gmra.mxu3 %vm139_vm2, %v1298_v13  ;;  %v1097_v15 = vsel %vm113_vm1, %v1096_v14, 0.0 }
 0xc1d   :  { %1098 = vadd.xlane.f32.xlu0 %v1097_v15  ;;  %1506 = vmatpush.msrb.mxu1 %v1150_v62 }
 0xc1e   :  { %1530 = vmatpush.msrb.mxu3 %v1151_v0 }
 0xc90   :  { %v1099_v9 = vpop.xlane.xlu0 %1098 }
 0xc91   :  { %v1100_v16 = vmul.f32 %v1099_v9, %v2081_v53  ;;  %v1198_v42 = vpop.f32.mrf.mxu1 }
 0xc93   :  { %v1101_v17 = vsub.f32 %v1096_v14, %v1100_v16 }
 0xc95   :  { %v1102_v19 = vmul.f32 %v1101_v17, %v1101_v17  ;;  %v1174_v38 = vpop.f32.mrf.mxu2 }
 0xc96   :  { %v1177_v39 = vadd.f32 %v1174_v38, %v1153_v37 }
 0xc97   :  { %v1103_v4 = vsel %vm113_vm1, %v1102_v19, 0.0  ;;  %v1222_v26 = vpop.f32.mrf.mxu3 }
 0xc98   :  { %1104 = vadd.xlane.f32.xlu1 %v1103_v4  ;;  %v1201_v18 = vadd.f32 %v1198_v42, %v1177_v39 }
 0xc99   :  { %v1294_v55 = vpop.f32.mrf.mxu1 }
 0xc9a   :  { %v1225_v47 = vadd.f32 %v1222_v26, %v1201_v18 }
 0xc9d   :  { %v1270_v50 = vpop.f32.mrf.mxu2 }
 0xc9f   :  { %v1318_v59 = vpop.f32.mrf.mxu3 }
 0xd0b   :  { %v1105_v28 = vpop.xlane.xlu1 %1104 }
 0xd0c   :  { %v1106_v20 = vmul.f32 %v1105_v28, %v2081_v53  ;;  %v1152_v53 = vld [vmem:[%s2191_s17 + $0x38] sm:$0xff]  ;;  %s1765_s17 = smov [#allocation2]  }
 0xd0d   :  { %s1586_s18 = sshll.u32 %s1765_s17, 4  ;;  %s1587_s18 = int_to_ptr.vmem [resolvable:$true] %s1586_s18 }
 0xd0e   :  { %v1107_v21 = vadd.f32 1e-05, %v1106_v20 }
 0xd10   :  { %1719 = vrsqrt.f32 %v1107_v21  ;;  %vm1114_vm15 = vweird.f32 %v1107_v21 }
 0xd16   :  { %v1720_v22 = vpop.eup %1719 }
 0xd17   :  { %v1109_v23 = vmul.f32 %v1720_v22, %v1107_v21  ;;  %vm1115_vm14 = vweird.f32 %v1720_v22 }
 0xd18   :  { %vm1116_vm0 = vmor %vm1114_vm15, %vm1115_vm14 }
 0xd19   :  { %v1110_v24 = vmul.f32 %v1720_v22, %v1109_v23 }
 0xd1b   :  { %v1111_v29 = vmul.f32 0.5, %v1110_v24 }
 0xd1d   :  { %v1112_v30 = vsub.f32 1.5, %v1111_v29 }
 0xd1f   :  { %v1113_v31 = vmul.f32 %v1720_v22, %v1112_v30 }
 0xd21   :  { %v1117_v52 = vsel %vm1116_vm0, %v1720_v22, %v1113_v31 }
 0xd22   :  { %v1118_v32 = vmul.f32 %v1117_v52, %v1101_v17 }
 0xd24   :  { %v1119_v33 = vmul.f32 %v2098_v49, %v1118_v32 }
 0xd26   :  { %v1120_v34 = vadd.f32 %v2103_v54, %v1119_v33 }
 0xd28   :  { %1637 = vmatmul.msk.f32.vlgmr.msrb.gmra.mxu0 %vm113_vm1, %v1120_v34 }
 0xd29   :  { %1340 = vmatpush.msrb.mxu0 %v1152_v53 }
 0xd30   :  { %1641 = vmatmul.msk.f32.vlgmr.msra.gmra.mxu0 %vm139_vm2, %v1226_v35 }
 0xd31   :  { %1458 = vmatpush.msra.mxu0 %v1148_v27 }
 0xd38   :  { %1645 = vmatmul.msk.f32.vlgmr.msrb.gmra.mxu0 %vm139_vm2, %v1322_v36 }
 0xd39   :  { %1554 = vmatpush.msrb.mxu0 %v1152_v53 }
 0xda5   :  { %v1141_v40 = vpop.f32.mrf.mxu0 }
 0xda6   :  { %v1142_v41 = vadd.f32 %v2130_v1, %v1141_v40 }
 0xda8   :  { %v1144_v43 = vmax.f32 %v1142_v41, 0.0 }
 0xdaa   :  { %1647 = vmatmul.msk.f32.vlgmr.msra.gmra.mxu2 %vm139_vm2, %v1144_v43  ;;  %v1392_v44 = vrot.slane %v1144_v43, 1  ;;  %v1416_v45 = vrot.slane %v1144_v43, 2  ;;  %v1440_v46 = vrot.slane %v1144_v43, 3  ;;  %v1464_v54 = vrot.slane %v1144_v43, 4 }
 0xdab   :  { %v1488_v56 = vrot.slane %v1144_v43, 5  ;;  %v1512_v57 = vrot.slane %v1144_v43, 6  ;;  %v1536_v60 = vrot.slane %v1144_v43, 7 }
 0xdac   :  { %1648 = vmatmul.msk.f32.vlgmr.msra.gmra.mxu1 %vm139_vm2, %v1392_v44  ;;  %1649 = vmatmul.msk.f32.vlgmr.msra.gmra.mxu3 %vm139_vm2, %v1416_v45 }
 0xdad   :  { %1650 = vmatmul.msk.f32.vlgmr.msra.gmra.mxu0 %vm139_vm2, %v1440_v46  ;;  %v1246_v48 = vpop.f32.mrf.mxu0 }
 0xdae   :  { %v1249_v49 = vadd.f32 %v1246_v48, %v1225_v47 }
 0xdb0   :  { %v1273_v51 = vadd.f32 %v1270_v50, %v1249_v49 }
 0xdb2   :  { %1651 = vmatmul.msk.f32.vlgmr.msrb.gmra.mxu2 %vm139_vm2, %v1464_v54  ;;  %v1297_v58 = vadd.f32 %v1294_v55, %v1273_v51 }
 0xdb4   :  { %1652 = vmatmul.msk.f32.vlgmr.msrb.gmra.mxu1 %vm139_vm2, %v1488_v56  ;;  %1653 = vmatmul.msk.f32.vlgmr.msrb.gmra.mxu3 %vm139_vm2, %v1512_v57  ;;  %v1321_v61 = vadd.f32 %v1318_v59, %v1297_v58 }
 0xdb5   :  { %1654 = vmatmul.msk.f32.vlgmr.msrb.gmra.mxu0 %vm139_vm2, %v1536_v60  ;;  %v1342_v62 = vpop.f32.mrf.mxu0  ;;  %vm1366_vm2 = vcmask 24576  }
 0xdb6   :  { %v1345_v0 = vadd.f32 %v1342_v62, %v1321_v61 }
 0xdb8   :  { %v1346_v1 = vmax.f32 %v1345_v0, 0.0 }
 0xdba   :  { %v1646_v2 = vmul.f32 -1.442695, %v1346_v1 }
 0xdbc   :  { %1721 = vpow2.f32 %v1646_v2 }
 0xdc2   :  { %v1722_v63 = vpop.eup %1721 }
 0xdc3   :  { %v1350_v3 = vadd.f32 1.0, %v1722_v63 }
 0xdc5   :  { %1723 = vrcp.f32 %v1350_v3  ;;  %v1362_v7 = vand.u32 2147483648, %v1350_v3  ;;  %v1360_v10 = vand.u32 2147483647, %v1350_v3  ;;  %vm1356_vm3 = vweird.f32 %v1350_v3 }
 0xdc7   :  { %v1363_v12 = vor.u32 1.1754944e-38, %v1362_v7  ;;  %vm1361_vm5 = vcmp.eq.f32.partialorder %v1360_v10, 8.507059e+37 }
 0xdcb   :  { %v1724_v25 = vpop.eup %1723 }
 0xdcc   :  { %v1352_v5 = vmul.f32 %v1724_v25, %v1350_v3  ;;  %vm1357_vm1 = vweird.f32 %v1724_v25 }
 0xdcd   :  { %vm1358_vm4 = vmor %vm1356_vm3, %vm1357_vm1 }
 0xdce   :  { %v1353_v6 = vsub.f32 1.0, %v1352_v5 }
 0xdd0   :  { %v1354_v8 = vmul.f32 %v1724_v25, %v1353_v6 }
 0xdd2   :  { %v1355_v11 = vadd.f32 %v1724_v25, %v1354_v8 }
 0xdd4   :  { %v1359_v13 = vsel %vm1358_vm4, %v1724_v25, %v1355_v11 }
 0xdd5   :  { %v1364_v14 = vsel %vm1361_vm5, %v1363_v12, %v1359_v13 }
 0xdd6   :  { %1367 = vst.msk [vmem:[#allocation2] sm:$0x1] %vm1366_vm2, %v1364_v14 }
 0xe29   :  { %v1412_v15 = vpop.f32.mrf.mxu1 }
 0xe2a   :  { %v1460_v4 = vpop.f32.mrf.mxu0 }
 0xe2d   :  { %v1388_v9 = vpop.f32.mrf.mxu2 }
 0xe2e   :  { %v1391_v16 = vadd.f32 %v1388_v9, %v1153_v37 }
 0xe2f   :  { %v1436_v17 = vpop.f32.mrf.mxu3 }
 0xe30   :  { %v1415_v19 = vadd.f32 %v1412_v15, %v1391_v16 }
 0xe31   :  { %v1508_v22 = vpop.f32.mrf.mxu1 }
 0xe32   :  { %v1439_v27 = vadd.f32 %v1436_v17, %v1415_v19  ;;  %v1556_v30 = vpop.f32.mrf.mxu0 }
 0xe34   :  { %v1463_v28 = vadd.f32 %v1460_v4, %v1439_v27 }
 0xe35   :  { %v1484_v20 = vpop.f32.mrf.mxu2 }
 0xe36   :  { %v1487_v21 = vadd.f32 %v1484_v20, %v1463_v28 }
 0xe37   :  { %v1532_v24 = vpop.f32.mrf.mxu3 }
 0xe38   :  { %v1511_v23 = vadd.f32 %v1508_v22, %v1487_v21 }
 0xe3a   :  { %v1535_v29 = vadd.f32 %v1532_v24, %v1511_v23 }
 0xe3c   :  { %v1559_v31 = vadd.f32 %v1556_v30, %v1535_v29 }
 0xe3e   :  { %v1560_v52 = vmax.f32 %v1559_v31, 0.0 }
 0xe40   :  { %v1655_v32 = vmul.f32 -1.442695, %v1560_v52 }
 0xe42   :  { %1725 = vpow2.f32 %v1655_v32 }
 0xe48   :  { %v1726_v33 = vpop.eup %1725 }
 0xe49   :  { %v1564_v34 = vadd.f32 1.0, %v1726_v33 }
 0xe4b   :  { %1727 = vrcp.f32 %v1564_v34  ;;  %v1576_v37 = vand.u32 2147483648, %v1564_v34  ;;  %v1574_v39 = vand.u32 2147483647, %v1564_v34  ;;  %vm1570_vm7 = vweird.f32 %v1564_v34 }
 0xe4d   :  { %v1577_v41 = vor.u32 1.1754944e-38, %v1576_v37  ;;  %vm1575_vm9 = vcmp.eq.f32.partialorder %v1574_v39, 8.507059e+37 }
 0xe51   :  { %v1728_v53 = vpop.eup %1727 }
 0xe52   :  { %v1566_v35 = vmul.f32 %v1728_v53, %v1564_v34  ;;  %vm1571_vm6 = vweird.f32 %v1728_v53 }
 0xe53   :  { %vm1572_vm8 = vmor %vm1570_vm7, %vm1571_vm6 }
 0xe54   :  { %v1567_v36 = vsub.f32 1.0, %v1566_v35 }
 0xe56   :  { %v1568_v38 = vmul.f32 %v1728_v53, %v1567_v36 }
 0xe58   :  { %v1569_v40 = vadd.f32 %v1728_v53, %v1568_v38 }
 0xe5a   :  { %v1573_v42 = vsel %vm1572_vm8, %v1728_v53, %v1569_v40 }
 0xe5b   :  { %v1578_v18 = vsel %vm1575_vm9, %v1577_v41, %v1573_v42 }
 0xe5c   :  { %1580 = vst.msk [vmem:[#allocation2 + $0x1] sm:$0x1] %vm1366_vm2, %v1578_v18 }
 0xe5d   :  { %1591 = dma.vmem_to_hbm [thread:$0]  %s1587_s18, 32, %s1589_s27, [#allocation3]  }
 0xe5e   :  { %1753 = dma.done.wait [#allocation3], 32  }
 0xe5f   :  { %1754 = vsyncadd [#allocation3], 4294967264 }
 0xe60   :  { %1596 = vsyncpa [#allocation3], 1 }

</bundles_post_ra>
